<compile_context>
chip_gen: v7x
topology: tpu7x:2x2x1
jax: 0.10.0
libtpu: 0.0.40
codegen_flags: <defaults>
</compile_context>

<pallas_src>
import functools

import jax
import jax.numpy as jnp
from jax.experimental import pallas as pl
from jax.experimental.pallas import tpu as pltpu


def _layer_norm(t, gamma, beta, eps=1e-5):
    mu = jnp.mean(t, axis=-1, keepdims=True)
    var = jnp.mean((t - mu) ** 2, axis=-1, keepdims=True)
    return (t - mu) * jax.lax.rsqrt(var + eps) * gamma + beta


def attention_kernel(x_ref, wqkv_ref, gq_ref, bq_ref, gk_ref, bk_ref,
                     wp_ref, bp_ref, o_ref, heads_ref,
                     *, num_heads, mxu_dtype, approx_recip):
    Bt, N, C = x_ref.shape
    D = C // num_heads
    M = Bt * N

    # Fold the batch tile into the matmul M dim (last dim unchanged -> cheap reshape).
    x = x_ref[...].reshape(M, C).astype(mxu_dtype)

    # Fused q/k/v projection: one (M, C) x (C, 3C) MXU matmul, f32 accumulation.
    # wqkv is already in mxu_dtype (cast once at param-prep time).
    qkv = jnp.dot(x, wqkv_ref[...], preferred_element_type=jnp.float32)   # (M, 3C) f32

    # LayerNorm over the full channel dim (pre head-split), q/k only -- f32 VPU math.
    # The q LayerNorm affine params already contain the attention scale (folded at
    # prep time), so no per-head `* scale` is needed below.
    q = _layer_norm(qkv[:, :C], gq_ref[...], bq_ref[...])
    k = _layer_norm(qkv[:, C:2 * C], gk_ref[...], bk_ref[...])
    v = qkv[:, 2 * C:]

    # (Bt, N, C) views so attention stays within each batch element.
    q3 = q.reshape(Bt, N, C)
    k3 = k.reshape(Bt, N, C)
    v3 = v.reshape(Bt, N, C)

    # TODO(synk): for realistic N (hundreds+), tile this flash-style (kv grid axis +
    # online-softmax m/l/acc scratch) instead of materializing full (Bt, N, N) scores.
    # TODO(synk): when C and D are multiples of 128 (pad channels in the wrapper),
    # replace this per-head loop with a single dot_general batched over (Bt, heads);
    # with the sub-128 head dims used here the static lane slices below lower more
    # reliably than the lane-splitting reshape + transpose that form needs.
    for h in range(num_heads):
        sl = slice(h * D, (h + 1) * D)
        qh = q3[:, :, sl].astype(mxu_dtype)                      # (Bt, N, D), pre-scaled
        kh = k3[:, :, sl].astype(mxu_dtype)                      # (Bt, N, D)
        vh = v3[:, :, sl].astype(mxu_dtype)                      # (Bt, N, D)

        # scores: (Bt, N, N) = qh @ kh^T, batched over the batch tile.
        s = jax.lax.dot_general(qh, kh, (((2,), (2,)), ((0,), (0,))),
                                preferred_element_type=jnp.float32)
        s = s - jnp.max(s, axis=-1, keepdims=True)
        p = jnp.exp(s)
        p = p * pl.reciprocal(jnp.sum(p, axis=-1, keepdims=True),
                              approx=approx_recip)
        # attn_drop is identity (p = 0.0)
        oh = jax.lax.dot_general(p.astype(mxu_dtype), vh,
                                 (((2,), (1,)), ((0,), (0,))),
                                 preferred_element_type=jnp.float32)  # (Bt, N, D)
        # heads scratch kept in mxu_dtype: half the scratch VMEM / store bytes and
        # no cast before the projection matmul.
        heads_ref[:, sl] = oh.reshape(M, D).astype(mxu_dtype)

    # Output projection (with bias); proj_drop is identity (p = 0.0).
    out = jnp.dot(heads_ref[...], wp_ref[...],
                  preferred_element_type=jnp.float32) + bp_ref[...]
    o_ref[...] = out.reshape(Bt, N, C).astype(o_ref.dtype)


def prepare_attention_params(params, *, num_heads, mxu_dtype=jnp.bfloat16):
    """One-time parameter preparation (do NOT redo per forward call).

    - fuses wq/wk/wv into one (C, 3C) matrix and casts it (and wp) to mxu_dtype
    - folds the attention scale (head_dim**-0.5) into the q-LayerNorm affine params
    """
    wq, wk, wv, gq, bq, gk, bk, wp, bp = params
    C = wq.shape[0]
    assert C % num_heads == 0, "dim must be divisible by num_heads"
    D = C // num_heads
    scale = D ** (-0.5)

    wqkv = jnp.concatenate([wq, wk, wv], axis=1).astype(mxu_dtype)   # (C, 3C)
    wp_c = wp.astype(mxu_dtype)                                      # (C, C)
    gq_s = (gq * scale).astype(jnp.float32).reshape(1, C)
    bq_s = (bq * scale).astype(jnp.float32).reshape(1, C)
    gk_f = jnp.asarray(gk, jnp.float32).reshape(1, C)
    bk_f = jnp.asarray(bk, jnp.float32).reshape(1, C)
    bp_f = jnp.asarray(bp, jnp.float32).reshape(1, C)
    return (wqkv, gq_s, bq_s, gk_f, bk_f, wp_c, bp_f)


def _vmem_limit_bytes():
    """~3/4 of physical VMEM capped at 96 MiB (=> ~96 MiB on v5e/v6e, ~48 MiB on v7x)."""
    try:
        cap = pltpu.get_tpu_info().vmem_capacity_bytes
    except Exception:
        cap = 128 * 1024 * 1024
    return int(min(cap * 3 // 4, 96 * 1024 * 1024))


def _estimate_vmem_bytes(block_b, N, C, mxu_itemsize):
    """Rough per-step working-set accounting: double-buffered x/out (f32),
    single-buffered weights (mxu dtype), heads scratch, qkv + per-head score
    intermediates."""
    M = block_b * N
    x_io = 2 * 2 * block_b * N * C * 4              # x + out, double-buffered
    weights = (3 * C * C + C * C) * mxu_itemsize + 5 * C * 4
    heads = M * C * mxu_itemsize
    qkv = M * 3 * C * 4
    scores = 2 * block_b * N * N * 4                # s + p live for one head at a time
    return x_io + weights + heads + qkv + scores


def _pick_block_b(B, N, C, mxu_itemsize, vmem_limit, target_rows=512):
    """Smallest divisor of B giving >= target_rows MXU rows, subject to
    (a) grid >= 2 when B allows (feed both TensorCores on v7x) and
    (b) the per-step VMEM estimate staying within ~60% of the scoped budget."""
    divisors = [d for d in range(1, B + 1) if B % d == 0]
    candidates = [d for d in divisors if B // d >= 2] or divisors
    fitting = [d for d in candidates
               if _estimate_vmem_bytes(d, N, C, mxu_itemsize) <= 0.6 * vmem_limit]
    fitting = fitting or candidates[:1]
    for d in fitting:
        if d * N >= target_rows:
            return d
    return fitting[-1]


def _build_attention_call(B, N, C, num_heads, block_b, x_dtype, mxu_dtype,
                          approx_recip, weight_buffer_count, vmem_limit):
    M = block_b * N

    def const_spec(shape):
        idx = lambda b: (0,) * len(shape)
        if weight_buffer_count is None:
            return pl.BlockSpec(shape, idx)
        # Constant-index blocks: single-buffer to save VMEM (matters on v7x).
        return pl.BlockSpec(shape, idx,
                            pipeline_mode=pl.Buffered(weight_buffer_count))

    kernel = functools.partial(attention_kernel, num_heads=num_heads,
                               mxu_dtype=mxu_dtype, approx_recip=approx_recip)

    return pl.pallas_call(
        kernel,
        out_shape=jax.ShapeDtypeStruct((B, N, C), x_dtype),
        grid_spec=pltpu.PrefetchScalarGridSpec(
            num_scalar_prefetch=0,
            grid=(B // block_b,),
            in_specs=[
                pl.BlockSpec((block_b, N, C), lambda b: (b, 0, 0)),   # x
                const_spec((C, 3 * C)),                               # wqkv (mxu dtype)
                const_spec((1, C)), const_spec((1, C)),               # gq*scale, bq*scale
                const_spec((1, C)), const_spec((1, C)),               # gk, bk
                const_spec((C, C)), const_spec((1, C)),               # wp (mxu dtype), bp
            ],
            out_specs=pl.BlockSpec((block_b, N, C), lambda b: (b, 0, 0)),
            scratch_shapes=[pltpu.VMEM((M, C), mxu_dtype)],           # per-head outputs
        ),
        compiler_params=pltpu.CompilerParams(
            dimension_semantics=("parallel",),
            vmem_limit_bytes=vmem_limit),
    )


def attention(x, prepped_params, *, num_heads, approx_recip=True, block_b=None):
    """Forward pass; `prepped_params` comes from prepare_attention_params (one-time)."""
    B, N, C = x.shape
    assert C % num_heads == 0, "dim must be divisible by num_heads"
    wqkv = prepped_params[0]
    assert wqkv.shape == (C, 3 * C)
    mxu_dtype = wqkv.dtype

    vmem_limit = _vmem_limit_bytes()
    if block_b is None:
        block_b = _pick_block_b(B, N, C, jnp.dtype(mxu_dtype).itemsize, vmem_limit)
    assert B % block_b == 0

    args = (x,) + tuple(prepped_params)
    try:
        call = _build_attention_call(B, N, C, num_heads, block_b, x.dtype, mxu_dtype,
                                     approx_recip, 1, vmem_limit)
        return call(*args)
    except Exception:
        # TODO(synk): pl.Buffered(1) single-buffering of the constant weight blocks is
        # a v7x VMEM optimization; retry with default double-buffering if this Pallas
        # version rejects buffer_count=1.
        call = _build_attention_call(B, N, C, num_heads, block_b, x.dtype, mxu_dtype,
                                     approx_recip, None, vmem_limit)
        return call(*args)


def attention_ref(x, params, *, num_heads):
    """Pure-JAX reference mirroring the PyTorch forward."""
    wq, wk, wv, gq, bq, gk, bk, wp, bp = params
    B, N, C = x.shape
    D = C // num_heads
    scale = D ** (-0.5)

    def ln(t, g, b):
        mu = jnp.mean(t, axis=-1, keepdims=True)
        var = jnp.mean((t - mu) ** 2, axis=-1, keepdims=True)
        return (t - mu) * jax.lax.rsqrt(var + 1e-5) * g + b

    q = ln(x @ wq, gq, bq).reshape(B, N, num_heads, D).transpose(0, 2, 1, 3)
    k = ln(x @ wk, gk, bk).reshape(B, N, num_heads, D).transpose(0, 2, 1, 3)
    v = (x @ wv).reshape(B, N, num_heads, D).transpose(0, 2, 1, 3)
    attn = jnp.einsum('bhqd,bhkd->bhqk', q, k) * scale
    attn = jax.nn.softmax(attn, axis=-1)
    out = jnp.einsum('bhqk,bhkd->bhqd', attn, v).transpose(0, 2, 1, 3).reshape(B, N, C)
    return out @ wp + bp


if __name__ == "__main__":
    B, N, C = 2, 8, 32
    num_heads = 4

    key = jax.random.PRNGKey(0)
    kx, k1, k2, k3, k4, k5, k6, k7, k8 = jax.random.split(key, 9)

    x = jax.random.normal(kx, (B, N, C), dtype=jnp.float32)

    # Linear weights stored as (C_in, C_out) (i.e. PyTorch weight transposed).
    wq = jax.random.normal(k1, (C, C), dtype=jnp.float32) * 0.05
    wk = jax.random.normal(k2, (C, C), dtype=jnp.float32) * 0.05
    wv = jax.random.normal(k3, (C, C), dtype=jnp.float32) * 0.05
    # LayerNorm params (deterministic, slightly perturbed from identity).
    gq = 1.0 + 0.1 * jax.random.normal(k4, (1, C), dtype=jnp.float32)
    bq = 0.1 * jax.random.normal(k5, (1, C), dtype=jnp.float32)
    gk = 1.0 + 0.1 * jax.random.normal(k6, (1, C), dtype=jnp.float32)
    bk = 0.1 * jax.random.normal(k7, (1, C), dtype=jnp.float32)
    # Output projection (with bias).
    wp = jax.random.normal(k8, (C, C), dtype=jnp.float32) * 0.05
    bp = 0.01 * jnp.arange(C, dtype=jnp.float32).reshape(1, C)

    params = (wq, wk, wv, gq, bq, gk, bk, wp, bp)
    ref = attention_ref(x, params, num_heads=num_heads)

    # Fast path (default): bf16 MXU operands, f32 accumulation, approx reciprocal.
    prepped_bf16 = prepare_attention_params(params, num_heads=num_heads,
                                            mxu_dtype=jnp.bfloat16)
    out_fast = jax.block_until_ready(
        attention(x, prepped_bf16, num_heads=num_heads))
    assert out_fast.shape == (B, N, C)
    assert jnp.allclose(out_fast, ref, rtol=5e-2, atol=5e-2), "bf16 path mismatch"

    # f32-operand path (exact reciprocal) -- tighter match vs reference.
    prepped_f32 = prepare_attention_params(params, num_heads=num_heads,
                                           mxu_dtype=jnp.float32)
    out_f32 = jax.block_until_ready(
        attention(x, prepped_f32, num_heads=num_heads, approx_recip=False))
    assert jnp.allclose(out_f32, ref, rtol=1e-2, atol=1e-2), "f32 path mismatch"

    print("KERNEL_OK")
</pallas_src>

<mosaic_0001>
module attributes {stable_mosaic.version = 11 : i64} {
  func.func @attention_kernel(%arg0: i32, %arg1: memref<1x8x32xf32, #tpu.memory_space<vmem>>, %arg2: memref<32x96xbf16, #tpu.memory_space<vmem>>, %arg3: memref<1x32xf32, #tpu.memory_space<vmem>>, %arg4: memref<1x32xf32, #tpu.memory_space<vmem>>, %arg5: memref<1x32xf32, #tpu.memory_space<vmem>>, %arg6: memref<1x32xf32, #tpu.memory_space<vmem>>, %arg7: memref<32x32xbf16, #tpu.memory_space<vmem>>, %arg8: memref<1x32xf32, #tpu.memory_space<vmem>>, %arg9: memref<1x8x32xf32, #tpu.memory_space<vmem>>, %arg10: memref<8x32xbf16, #tpu.memory_space<vmem>>) attributes {dimension_semantics = [#tpu.dimension_semantics<parallel>], iteration_bounds = array<i64: 2>, scalar_prefetch = 0 : i64, scratch_operands = 1 : i64, tpu.core_type = #tpu.core_type<tc>, window_params = [{transform_indices = @transform_0, window_bounds = array<i64: 1, 8, 32>}, {pipeline_mode = #tpu.pipeline_mode<synchronous>, transform_indices = @transform_1, window_bounds = array<i64: 32, 96>}, {pipeline_mode = #tpu.pipeline_mode<synchronous>, transform_indices = @transform_2, window_bounds = array<i64: 1, 32>}, {pipeline_mode = #tpu.pipeline_mode<synchronous>, transform_indices = @transform_3, window_bounds = array<i64: 1, 32>}, {pipeline_mode = #tpu.pipeline_mode<synchronous>, transform_indices = @transform_4, window_bounds = array<i64: 1, 32>}, {pipeline_mode = #tpu.pipeline_mode<synchronous>, transform_indices = @transform_5, window_bounds = array<i64: 1, 32>}, {pipeline_mode = #tpu.pipeline_mode<synchronous>, transform_indices = @transform_6, window_bounds = array<i64: 32, 32>}, {pipeline_mode = #tpu.pipeline_mode<synchronous>, transform_indices = @transform_7, window_bounds = array<i64: 1, 32>}, {transform_indices = @transform_8, window_bounds = array<i64: 1, 8, 32>}]} {
    %c0 = arith.constant 0 : index
    %c0_0 = arith.constant 0 : index
    %c0_1 = arith.constant 0 : index
    %0 = vector.load %arg1[%c0, %c0_0, %c0_1] : memref<1x8x32xf32, #tpu.memory_space<vmem>>, vector<1x8x32xf32>
    %1 = vector.shape_cast %0 : vector<1x8x32xf32> to vector<8x32xf32>
    %2 = arith.truncf %1 : vector<8x32xf32> to vector<8x32xbf16>
    %c0_2 = arith.constant 0 : index
    %c0_3 = arith.constant 0 : index
    %3 = vector.load %arg2[%c0_2, %c0_3] : memref<32x96xbf16, #tpu.memory_space<vmem>>, vector<32x96xbf16>
    %cst = arith.constant dense<0.000000e+00> : vector<8x96xf32>
    %4 = tpu.matmul %2, %3, %cst {dimension_numbers = #tpu.dot_dimension_numbers<[1], [0], [0], [1], [0, 0, 1, 1], [], []>} : vector<8x32xbf16>, vector<32x96xbf16>, vector<8x96xf32> -> vector<8x96xf32>
    %5 = vector.extract_strided_slice %4 {offsets = [0, 0], sizes = [8, 32], strides = [1, 1]} : vector<8x96xf32> to vector<8x32xf32>
    %c0_4 = arith.constant 0 : index
    %c0_5 = arith.constant 0 : index
    %6 = vector.load %arg3[%c0_4, %c0_5] : memref<1x32xf32, #tpu.memory_space<vmem>>, vector<1x32xf32>
    %c0_6 = arith.constant 0 : index
    %c0_7 = arith.constant 0 : index
    %7 = vector.load %arg4[%c0_6, %c0_7] : memref<1x32xf32, #tpu.memory_space<vmem>>, vector<1x32xf32>
    %cst_8 = arith.constant dense<0.000000e+00> : vector<8xf32>
    %8 = vector.multi_reduction <add>, %5, %cst_8 [1] : vector<8x32xf32> to vector<8xf32>
    %9 = vector.shape_cast %8 : vector<8xf32> to vector<8x1xf32>
    %cst_9 = arith.constant 3.200000e+01 : f32
    %10 = vector.broadcast %cst_9 : f32 to vector<8x1xf32>
    %11 = arith.divf %9, %10 : vector<8x1xf32>
    %12 = vector.broadcast %11 : vector<8x1xf32> to vector<8x32xf32>
    %13 = arith.subf %5, %12 : vector<8x32xf32>
    %14 = arith.mulf %13, %13 : vector<8x32xf32>
    %cst_10 = arith.constant dense<0.000000e+00> : vector<8xf32>
    %15 = vector.multi_reduction <add>, %14, %cst_10 [1] : vector<8x32xf32> to vector<8xf32>
    %16 = vector.shape_cast %15 : vector<8xf32> to vector<8x1xf32>
    %cst_11 = arith.constant 3.200000e+01 : f32
    %17 = vector.broadcast %cst_11 : f32 to vector<8x1xf32>
    %18 = arith.divf %16, %17 : vector<8x1xf32>
    %19 = vector.broadcast %11 : vector<8x1xf32> to vector<8x32xf32>
    %20 = arith.subf %5, %19 : vector<8x32xf32>
    %cst_12 = arith.constant 9.99999974E-6 : f32
    %21 = vector.broadcast %cst_12 : f32 to vector<8x1xf32>
    %22 = arith.addf %18, %21 : vector<8x1xf32>
    %23 = math.rsqrt %22 : vector<8x1xf32>
    %24 = vector.broadcast %23 : vector<8x1xf32> to vector<8x32xf32>
    %25 = arith.mulf %20, %24 : vector<8x32xf32>
    %26 = vector.broadcast %6 : vector<1x32xf32> to vector<8x32xf32>
    %27 = arith.mulf %25, %26 : vector<8x32xf32>
    %28 = vector.broadcast %7 : vector<1x32xf32> to vector<8x32xf32>
    %29 = arith.addf %27, %28 : vector<8x32xf32>
    %30 = vector.extract_strided_slice %4 {offsets = [0, 32], sizes = [8, 32], strides = [1, 1]} : vector<8x96xf32> to vector<8x32xf32>
    %c0_13 = arith.constant 0 : index
    %c0_14 = arith.constant 0 : index
    %31 = vector.load %arg5[%c0_13, %c0_14] : memref<1x32xf32, #tpu.memory_space<vmem>>, vector<1x32xf32>
    %c0_15 = arith.constant 0 : index
    %c0_16 = arith.constant 0 : index
    %32 = vector.load %arg6[%c0_15, %c0_16] : memref<1x32xf32, #tpu.memory_space<vmem>>, vector<1x32xf32>
    %cst_17 = arith.constant dense<0.000000e+00> : vector<8xf32>
    %33 = vector.multi_reduction <add>, %30, %cst_17 [1] : vector<8x32xf32> to vector<8xf32>
    %34 = vector.shape_cast %33 : vector<8xf32> to vector<8x1xf32>
    %cst_18 = arith.constant 3.200000e+01 : f32
    %35 = vector.broadcast %cst_18 : f32 to vector<8x1xf32>
    %36 = arith.divf %34, %35 : vector<8x1xf32>
    %37 = vector.broadcast %36 : vector<8x1xf32> to vector<8x32xf32>
    %38 = arith.subf %30, %37 : vector<8x32xf32>
    %39 = arith.mulf %38, %38 : vector<8x32xf32>
    %cst_19 = arith.constant dense<0.000000e+00> : vector<8xf32>
    %40 = vector.multi_reduction <add>, %39, %cst_19 [1] : vector<8x32xf32> to vector<8xf32>
    %41 = vector.shape_cast %40 : vector<8xf32> to vector<8x1xf32>
    %cst_20 = arith.constant 3.200000e+01 : f32
    %42 = vector.broadcast %cst_20 : f32 to vector<8x1xf32>
    %43 = arith.divf %41, %42 : vector<8x1xf32>
    %44 = vector.broadcast %36 : vector<8x1xf32> to vector<8x32xf32>
    %45 = arith.subf %30, %44 : vector<8x32xf32>
    %cst_21 = arith.constant 9.99999974E-6 : f32
    %46 = vector.broadcast %cst_21 : f32 to vector<8x1xf32>
    %47 = arith.addf %43, %46 : vector<8x1xf32>
    %48 = math.rsqrt %47 : vector<8x1xf32>
    %49 = vector.broadcast %48 : vector<8x1xf32> to vector<8x32xf32>
    %50 = arith.mulf %45, %49 : vector<8x32xf32>
    %51 = vector.broadcast %31 : vector<1x32xf32> to vector<8x32xf32>
    %52 = arith.mulf %50, %51 : vector<8x32xf32>
    %53 = vector.broadcast %32 : vector<1x32xf32> to vector<8x32xf32>
    %54 = arith.addf %52, %53 : vector<8x32xf32>
    %55 = vector.extract_strided_slice %4 {offsets = [0, 64], sizes = [8, 32], strides = [1, 1]} : vector<8x96xf32> to vector<8x32xf32>
    %56 = vector.shape_cast %29 : vector<8x32xf32> to vector<1x8x32xf32>
    %57 = vector.shape_cast %54 : vector<8x32xf32> to vector<1x8x32xf32>
    %58 = vector.shape_cast %55 : vector<8x32xf32> to vector<1x8x32xf32>
    %59 = vector.extract_strided_slice %56 {offsets = [0, 0, 0], sizes = [1, 8, 8], strides = [1, 1, 1]} : vector<1x8x32xf32> to vector<1x8x8xf32>
    %60 = arith.truncf %59 : vector<1x8x8xf32> to vector<1x8x8xbf16>
    %61 = vector.extract_strided_slice %57 {offsets = [0, 0, 0], sizes = [1, 8, 8], strides = [1, 1, 1]} : vector<1x8x32xf32> to vector<1x8x8xf32>
    %62 = arith.truncf %61 : vector<1x8x8xf32> to vector<1x8x8xbf16>
    %63 = vector.extract_strided_slice %58 {offsets = [0, 0, 0], sizes = [1, 8, 8], strides = [1, 1, 1]} : vector<1x8x32xf32> to vector<1x8x8xf32>
    %64 = arith.truncf %63 : vector<1x8x8xf32> to vector<1x8x8xbf16>
    %cst_22 = arith.constant dense<0.000000e+00> : vector<1x8x8xf32>
    %65 = tpu.matmul %60, %62, %cst_22 {dimension_numbers = #tpu.dot_dimension_numbers<[2], [2], [1], [1], [0, 0, 0, 1, 1, 1], [0], [0]>} : vector<1x8x8xbf16>, vector<1x8x8xbf16>, vector<1x8x8xf32> -> vector<1x8x8xf32>
    %cst_23 = arith.constant dense<0xFF800000> : vector<1x8xf32>
    %66 = vector.multi_reduction <maximumf>, %65, %cst_23 [2] : vector<1x8x8xf32> to vector<1x8xf32>
    %67 = vector.shape_cast %66 : vector<1x8xf32> to vector<1x8x1xf32>
    %68 = vector.broadcast %67 : vector<1x8x1xf32> to vector<1x8x8xf32>
    %69 = arith.subf %65, %68 : vector<1x8x8xf32>
    %70 = math.exp %69 : vector<1x8x8xf32>
    %cst_24 = arith.constant dense<0.000000e+00> : vector<1x8xf32>
    %71 = vector.multi_reduction <add>, %70, %cst_24 [2] : vector<1x8x8xf32> to vector<1x8xf32>
    %72 = vector.shape_cast %71 : vector<1x8xf32> to vector<1x8x1xf32>
    %73 = tpu.reciprocal %72 {approx = true} : vector<1x8x1xf32> -> vector<1x8x1xf32>
    %74 = vector.broadcast %73 : vector<1x8x1xf32> to vector<1x8x8xf32>
    %75 = arith.mulf %70, %74 : vector<1x8x8xf32>
    %76 = arith.truncf %75 : vector<1x8x8xf32> to vector<1x8x8xbf16>
    %cst_25 = arith.constant dense<0.000000e+00> : vector<1x8x8xf32>
    %77 = tpu.matmul %76, %64, %cst_25 {dimension_numbers = #tpu.dot_dimension_numbers<[2], [1], [1], [2], [0, 0, 0, 1, 1, 2], [0], [0]>} : vector<1x8x8xbf16>, vector<1x8x8xbf16>, vector<1x8x8xf32> -> vector<1x8x8xf32>
    %78 = vector.shape_cast %77 : vector<1x8x8xf32> to vector<8x8xf32>
    %79 = arith.truncf %78 : vector<8x8xf32> to vector<8x8xbf16>
    %c0_26 = arith.constant 0 : index
    %c0_27 = arith.constant 0 : index
    %80 = vector.load %arg10[%c0_26, %c0_27] : memref<8x32xbf16, #tpu.memory_space<vmem>>, vector<8x8xbf16>
    tpu.vector_store %arg10[%c0_26, %c0_27], %79 {strides = array<i32>} : memref<8x32xbf16, #tpu.memory_space<vmem>>, vector<8x8xbf16>,
    %81 = vector.extract_strided_slice %56 {offsets = [0, 0, 8], sizes = [1, 8, 8], strides = [1, 1, 1]} : vector<1x8x32xf32> to vector<1x8x8xf32>
    %82 = arith.truncf %81 : vector<1x8x8xf32> to vector<1x8x8xbf16>
    %83 = vector.extract_strided_slice %57 {offsets = [0, 0, 8], sizes = [1, 8, 8], strides = [1, 1, 1]} : vector<1x8x32xf32> to vector<1x8x8xf32>
    %84 = arith.truncf %83 : vector<1x8x8xf32> to vector<1x8x8xbf16>
    %85 = vector.extract_strided_slice %58 {offsets = [0, 0, 8], sizes = [1, 8, 8], strides = [1, 1, 1]} : vector<1x8x32xf32> to vector<1x8x8xf32>
    %86 = arith.truncf %85 : vector<1x8x8xf32> to vector<1x8x8xbf16>
    %cst_28 = arith.constant dense<0.000000e+00> : vector<1x8x8xf32>
    %87 = tpu.matmul %82, %84, %cst_28 {dimension_numbers = #tpu.dot_dimension_numbers<[2], [2], [1], [1], [0, 0, 0, 1, 1, 1], [0], [0]>} : vector<1x8x8xbf16>, vector<1x8x8xbf16>, vector<1x8x8xf32> -> vector<1x8x8xf32>
    %cst_29 = arith.constant dense<0xFF800000> : vector<1x8xf32>
    %88 = vector.multi_reduction <maximumf>, %87, %cst_29 [2] : vector<1x8x8xf32> to vector<1x8xf32>
    %89 = vector.shape_cast %88 : vector<1x8xf32> to vector<1x8x1xf32>
    %90 = vector.broadcast %89 : vector<1x8x1xf32> to vector<1x8x8xf32>
    %91 = arith.subf %87, %90 : vector<1x8x8xf32>
    %92 = math.exp %91 : vector<1x8x8xf32>
    %cst_30 = arith.constant dense<0.000000e+00> : vector<1x8xf32>
    %93 = vector.multi_reduction <add>, %92, %cst_30 [2] : vector<1x8x8xf32> to vector<1x8xf32>
    %94 = vector.shape_cast %93 : vector<1x8xf32> to vector<1x8x1xf32>
    %95 = tpu.reciprocal %94 {approx = true} : vector<1x8x1xf32> -> vector<1x8x1xf32>
    %96 = vector.broadcast %95 : vector<1x8x1xf32> to vector<1x8x8xf32>
    %97 = arith.mulf %92, %96 : vector<1x8x8xf32>
    %98 = arith.truncf %97 : vector<1x8x8xf32> to vector<1x8x8xbf16>
    %cst_31 = arith.constant dense<0.000000e+00> : vector<1x8x8xf32>
    %99 = tpu.matmul %98, %86, %cst_31 {dimension_numbers = #tpu.dot_dimension_numbers<[2], [1], [1], [2], [0, 0, 0, 1, 1, 2], [0], [0]>} : vector<1x8x8xbf16>, vector<1x8x8xbf16>, vector<1x8x8xf32> -> vector<1x8x8xf32>
    %100 = vector.shape_cast %99 : vector<1x8x8xf32> to vector<8x8xf32>
    %101 = arith.truncf %100 : vector<8x8xf32> to vector<8x8xbf16>
    %c0_32 = arith.constant 0 : index
    %c8 = arith.constant 8 : index
    %102 = vector.load %arg10[%c0_32, %c8] : memref<8x32xbf16, #tpu.memory_space<vmem>>, vector<8x8xbf16>
    tpu.vector_store %arg10[%c0_32, %c8], %101 {strides = array<i32>} : memref<8x32xbf16, #tpu.memory_space<vmem>>, vector<8x8xbf16>,
    %103 = vector.extract_strided_slice %56 {offsets = [0, 0, 16], sizes = [1, 8, 8], strides = [1, 1, 1]} : vector<1x8x32xf32> to vector<1x8x8xf32>
    %104 = arith.truncf %103 : vector<1x8x8xf32> to vector<1x8x8xbf16>
    %105 = vector.extract_strided_slice %57 {offsets = [0, 0, 16], sizes = [1, 8, 8], strides = [1, 1, 1]} : vector<1x8x32xf32> to vector<1x8x8xf32>
    %106 = arith.truncf %105 : vector<1x8x8xf32> to vector<1x8x8xbf16>
    %107 = vector.extract_strided_slice %58 {offsets = [0, 0, 16], sizes = [1, 8, 8], strides = [1, 1, 1]} : vector<1x8x32xf32> to vector<1x8x8xf32>
    %108 = arith.truncf %107 : vector<1x8x8xf32> to vector<1x8x8xbf16>
    %cst_33 = arith.constant dense<0.000000e+00> : vector<1x8x8xf32>
    %109 = tpu.matmul %104, %106, %cst_33 {dimension_numbers = #tpu.dot_dimension_numbers<[2], [2], [1], [1], [0, 0, 0, 1, 1, 1], [0], [0]>} : vector<1x8x8xbf16>, vector<1x8x8xbf16>, vector<1x8x8xf32> -> vector<1x8x8xf32>
    %cst_34 = arith.constant dense<0xFF800000> : vector<1x8xf32>
    %110 = vector.multi_reduction <maximumf>, %109, %cst_34 [2] : vector<1x8x8xf32> to vector<1x8xf32>
    %111 = vector.shape_cast %110 : vector<1x8xf32> to vector<1x8x1xf32>
    %112 = vector.broadcast %111 : vector<1x8x1xf32> to vector<1x8x8xf32>
    %113 = arith.subf %109, %112 : vector<1x8x8xf32>
    %114 = math.exp %113 : vector<1x8x8xf32>
    %cst_35 = arith.constant dense<0.000000e+00> : vector<1x8xf32>
    %115 = vector.multi_reduction <add>, %114, %cst_35 [2] : vector<1x8x8xf32> to vector<1x8xf32>
    %116 = vector.shape_cast %115 : vector<1x8xf32> to vector<1x8x1xf32>
    %117 = tpu.reciprocal %116 {approx = true} : vector<1x8x1xf32> -> vector<1x8x1xf32>
    %118 = vector.broadcast %117 : vector<1x8x1xf32> to vector<1x8x8xf32>
    %119 = arith.mulf %114, %118 : vector<1x8x8xf32>
    %120 = arith.truncf %119 : vector<1x8x8xf32> to vector<1x8x8xbf16>
    %cst_36 = arith.constant dense<0.000000e+00> : vector<1x8x8xf32>
    %121 = tpu.matmul %120, %108, %cst_36 {dimension_numbers = #tpu.dot_dimension_numbers<[2], [1], [1], [2], [0, 0, 0, 1, 1, 2], [0], [0]>} : vector<1x8x8xbf16>, vector<1x8x8xbf16>, vector<1x8x8xf32> -> vector<1x8x8xf32>
    %122 = vector.shape_cast %121 : vector<1x8x8xf32> to vector<8x8xf32>
    %123 = arith.truncf %122 : vector<8x8xf32> to vector<8x8xbf16>
    %c0_37 = arith.constant 0 : index
    %c16 = arith.constant 16 : index
    %124 = vector.load %arg10[%c0_37, %c16] : memref<8x32xbf16, #tpu.memory_space<vmem>>, vector<8x8xbf16>
    tpu.vector_store %arg10[%c0_37, %c16], %123 {strides = array<i32>} : memref<8x32xbf16, #tpu.memory_space<vmem>>, vector<8x8xbf16>,
    %125 = vector.extract_strided_slice %56 {offsets = [0, 0, 24], sizes = [1, 8, 8], strides = [1, 1, 1]} : vector<1x8x32xf32> to vector<1x8x8xf32>
    %126 = arith.truncf %125 : vector<1x8x8xf32> to vector<1x8x8xbf16>
    %127 = vector.extract_strided_slice %57 {offsets = [0, 0, 24], sizes = [1, 8, 8], strides = [1, 1, 1]} : vector<1x8x32xf32> to vector<1x8x8xf32>
    %128 = arith.truncf %127 : vector<1x8x8xf32> to vector<1x8x8xbf16>
    %129 = vector.extract_strided_slice %58 {offsets = [0, 0, 24], sizes = [1, 8, 8], strides = [1, 1, 1]} : vector<1x8x32xf32> to vector<1x8x8xf32>
    %130 = arith.truncf %129 : vector<1x8x8xf32> to vector<1x8x8xbf16>
    %cst_38 = arith.constant dense<0.000000e+00> : vector<1x8x8xf32>
    %131 = tpu.matmul %126, %128, %cst_38 {dimension_numbers = #tpu.dot_dimension_numbers<[2], [2], [1], [1], [0, 0, 0, 1, 1, 1], [0], [0]>} : vector<1x8x8xbf16>, vector<1x8x8xbf16>, vector<1x8x8xf32> -> vector<1x8x8xf32>
    %cst_39 = arith.constant dense<0xFF800000> : vector<1x8xf32>
    %132 = vector.multi_reduction <maximumf>, %131, %cst_39 [2] : vector<1x8x8xf32> to vector<1x8xf32>
    %133 = vector.shape_cast %132 : vector<1x8xf32> to vector<1x8x1xf32>
    %134 = vector.broadcast %133 : vector<1x8x1xf32> to vector<1x8x8xf32>
    %135 = arith.subf %131, %134 : vector<1x8x8xf32>
    %136 = math.exp %135 : vector<1x8x8xf32>
    %cst_40 = arith.constant dense<0.000000e+00> : vector<1x8xf32>
    %137 = vector.multi_reduction <add>, %136, %cst_40 [2] : vector<1x8x8xf32> to vector<1x8xf32>
    %138 = vector.shape_cast %137 : vector<1x8xf32> to vector<1x8x1xf32>
    %139 = tpu.reciprocal %138 {approx = true} : vector<1x8x1xf32> -> vector<1x8x1xf32>
    %140 = vector.broadcast %139 : vector<1x8x1xf32> to vector<1x8x8xf32>
    %141 = arith.mulf %136, %140 : vector<1x8x8xf32>
    %142 = arith.truncf %141 : vector<1x8x8xf32> to vector<1x8x8xbf16>
    %cst_41 = arith.constant dense<0.000000e+00> : vector<1x8x8xf32>
    %143 = tpu.matmul %142, %130, %cst_41 {dimension_numbers = #tpu.dot_dimension_numbers<[2], [1], [1], [2], [0, 0, 0, 1, 1, 2], [0], [0]>} : vector<1x8x8xbf16>, vector<1x8x8xbf16>, vector<1x8x8xf32> -> vector<1x8x8xf32>
    %144 = vector.shape_cast %143 : vector<1x8x8xf32> to vector<8x8xf32>
    %145 = arith.truncf %144 : vector<8x8xf32> to vector<8x8xbf16>
    %c0_42 = arith.constant 0 : index
    %c24 = arith.constant 24 : index
    %146 = vector.load %arg10[%c0_42, %c24] : memref<8x32xbf16, #tpu.memory_space<vmem>>, vector<8x8xbf16>
    tpu.vector_store %arg10[%c0_42, %c24], %145 {strides = array<i32>} : memref<8x32xbf16, #tpu.memory_space<vmem>>, vector<8x8xbf16>,
    %c0_43 = arith.constant 0 : index
    %c0_44 = arith.constant 0 : index
    %147 = vector.load %arg10[%c0_43, %c0_44] : memref<8x32xbf16, #tpu.memory_space<vmem>>, vector<8x32xbf16>
    %c0_45 = arith.constant 0 : index
    %c0_46 = arith.constant 0 : index
    %148 = vector.load %arg7[%c0_45, %c0_46] : memref<32x32xbf16, #tpu.memory_space<vmem>>, vector<32x32xbf16>
    %cst_47 = arith.constant dense<0.000000e+00> : vector<8x32xf32>
    %149 = tpu.matmul %147, %148, %cst_47 {dimension_numbers = #tpu.dot_dimension_numbers<[1], [0], [0], [1], [0, 0, 1, 1], [], []>} : vector<8x32xbf16>, vector<32x32xbf16>, vector<8x32xf32> -> vector<8x32xf32>
    %c0_48 = arith.constant 0 : index
    %c0_49 = arith.constant 0 : index
    %150 = vector.load %arg8[%c0_48, %c0_49] : memref<1x32xf32, #tpu.memory_space<vmem>>, vector<1x32xf32>
    %151 = vector.broadcast %150 : vector<1x32xf32> to vector<8x32xf32>
    %152 = arith.addf %149, %151 : vector<8x32xf32>
    %153 = vector.shape_cast %152 : vector<8x32xf32> to vector<1x8x32xf32>
    %c0_50 = arith.constant 0 : index
    %c0_51 = arith.constant 0 : index
    %c0_52 = arith.constant 0 : index
    %154 = vector.load %arg9[%c0_50, %c0_51, %c0_52] : memref<1x8x32xf32, #tpu.memory_space<vmem>>, vector<1x8x32xf32>
    tpu.vector_store %arg9[%c0_50, %c0_51, %c0_52], %153 {strides = array<i32>} : memref<1x8x32xf32, #tpu.memory_space<vmem>>, vector<1x8x32xf32>,
    return
  }
  func.func @transform_0(%arg0: i32) -> (i32, i32, i32) {
    %c0_i32 = arith.constant 0 : i32
    %c0_i32_0 = arith.constant 0 : i32
    %c0_i32_1 = arith.constant 0 : i32
    return %arg0, %c0_i32, %c0_i32_0 : i32, i32, i32
  }
  func.func @transform_1(%arg0: i32) -> (i32, i32) {
    %c0_i32 = arith.constant 0 : i32
    %c0_i32_0 = arith.constant 0 : i32
    %c0_i32_1 = arith.constant 0 : i32
    return %c0_i32, %c0_i32_0 : i32, i32
  }
  func.func @transform_2(%arg0: i32) -> (i32, i32) {
    %c0_i32 = arith.constant 0 : i32
    %c0_i32_0 = arith.constant 0 : i32
    %c0_i32_1 = arith.constant 0 : i32
    return %c0_i32, %c0_i32_0 : i32, i32
  }
  func.func @transform_3(%arg0: i32) -> (i32, i32) {
    %c0_i32 = arith.constant 0 : i32
    %c0_i32_0 = arith.constant 0 : i32
    %c0_i32_1 = arith.constant 0 : i32
    return %c0_i32, %c0_i32_0 : i32, i32
  }
  func.func @transform_4(%arg0: i32) -> (i32, i32) {
    %c0_i32 = arith.constant 0 : i32
    %c0_i32_0 = arith.constant 0 : i32
    %c0_i32_1 = arith.constant 0 : i32
    return %c0_i32, %c0_i32_0 : i32, i32
  }
  func.func @transform_5(%arg0: i32) -> (i32, i32) {
    %c0_i32 = arith.constant 0 : i32
    %c0_i32_0 = arith.constant 0 : i32
    %c0_i32_1 = arith.constant 0 : i32
    return %c0_i32, %c0_i32_0 : i32, i32
  }
  func.func @transform_6(%arg0: i32) -> (i32, i32) {
    %c0_i32 = arith.constant 0 : i32
    %c0_i32_0 = arith.constant 0 : i32
    %c0_i32_1 = arith.constant 0 : i32
    return %c0_i32, %c0_i32_0 : i32, i32
  }
  func.func @transform_7(%arg0: i32) -> (i32, i32) {
    %c0_i32 = arith.constant 0 : i32
    %c0_i32_0 = arith.constant 0 : i32
    %c0_i32_1 = arith.constant 0 : i32
    return %c0_i32, %c0_i32_0 : i32, i32
  }
  func.func @transform_8(%arg0: i32) -> (i32, i32, i32) {
    %c0_i32 = arith.constant 0 : i32
    %c0_i32_0 = arith.constant 0 : i32
    %c0_i32_1 = arith.constant 0 : i32
    return %arg0, %c0_i32, %c0_i32_0 : i32, i32, i32
  }
}

module attributes {stable_mosaic.version = 11 : i64} {
  func.func @attention_kernel(%arg0: i32, %arg1: memref<1x8x32xf32, #tpu.memory_space<vmem>>, %arg2: memref<32x96xbf16, #tpu.memory_space<vmem>>, %arg3: memref<1x32xf32, #tpu.memory_space<vmem>>, %arg4: memref<1x32xf32, #tpu.memory_space<vmem>>, %arg5: memref<1x32xf32, #tpu.memory_space<vmem>>, %arg6: memref<1x32xf32, #tpu.memory_space<vmem>>, %arg7: memref<32x32xbf16, #tpu.memory_space<vmem>>, %arg8: memref<1x32xf32, #tpu.memory_space<vmem>>, %arg9: memref<1x8x32xf32, #tpu.memory_space<vmem>>, %arg10: memref<8x32xbf16, #tpu.memory_space<vmem>>) attributes {dimension_semantics = [#tpu.dimension_semantics<parallel>], iteration_bounds = array<i64: 2>, scalar_prefetch = 0 : i64, scratch_operands = 1 : i64, tpu.core_type = #tpu.core_type<tc>, window_params = [{transform_indices = @transform_0, window_bounds = array<i64: 1, 8, 32>}, {pipeline_mode = #tpu.pipeline_mode<synchronous>, transform_indices = @transform_1, window_bounds = array<i64: 32, 96>}, {pipeline_mode = #tpu.pipeline_mode<synchronous>, transform_indices = @transform_2, window_bounds = array<i64: 1, 32>}, {pipeline_mode = #tpu.pipeline_mode<synchronous>, transform_indices = @transform_3, window_bounds = array<i64: 1, 32>}, {pipeline_mode = #tpu.pipeline_mode<synchronous>, transform_indices = @transform_4, window_bounds = array<i64: 1, 32>}, {pipeline_mode = #tpu.pipeline_mode<synchronous>, transform_indices = @transform_5, window_bounds = array<i64: 1, 32>}, {pipeline_mode = #tpu.pipeline_mode<synchronous>, transform_indices = @transform_6, window_bounds = array<i64: 32, 32>}, {pipeline_mode = #tpu.pipeline_mode<synchronous>, transform_indices = @transform_7, window_bounds = array<i64: 1, 32>}, {transform_indices = @transform_8, window_bounds = array<i64: 1, 8, 32>}]} {
    %c0 = arith.constant 0 : index
    %c0_0 = arith.constant 0 : index
    %c0_1 = arith.constant 0 : index
    %0 = vector.load %arg1[%c0, %c0_0, %c0_1] : memref<1x8x32xf32, #tpu.memory_space<vmem>>, vector<1x8x32xf32>
    %1 = vector.shape_cast %0 : vector<1x8x32xf32> to vector<8x32xf32>
    %2 = arith.truncf %1 : vector<8x32xf32> to vector<8x32xbf16>
    %c0_2 = arith.constant 0 : index
    %c0_3 = arith.constant 0 : index
    %3 = vector.load %arg2[%c0_2, %c0_3] : memref<32x96xbf16, #tpu.memory_space<vmem>>, vector<32x96xbf16>
    %cst = arith.constant dense<0.000000e+00> : vector<8x96xf32>
    %4 = tpu.matmul %2, %3, %cst {dimension_numbers = #tpu.dot_dimension_numbers<[1], [0], [0], [1], [0, 0, 1, 1], [], []>} : vector<8x32xbf16>, vector<32x96xbf16>, vector<8x96xf32> -> vector<8x96xf32>
    %5 = vector.extract_strided_slice %4 {offsets = [0, 0], sizes = [8, 32], strides = [1, 1]} : vector<8x96xf32> to vector<8x32xf32>
    %c0_4 = arith.constant 0 : index
    %c0_5 = arith.constant 0 : index
    %6 = vector.load %arg3[%c0_4, %c0_5] : memref<1x32xf32, #tpu.memory_space<vmem>>, vector<1x32xf32>
    %c0_6 = arith.constant 0 : index
    %c0_7 = arith.constant 0 : index
    %7 = vector.load %arg4[%c0_6, %c0_7] : memref<1x32xf32, #tpu.memory_space<vmem>>, vector<1x32xf32>
    %cst_8 = arith.constant dense<0.000000e+00> : vector<8xf32>
    %8 = vector.multi_reduction <add>, %5, %cst_8 [1] : vector<8x32xf32> to vector<8xf32>
    %9 = vector.shape_cast %8 : vector<8xf32> to vector<8x1xf32>
    %cst_9 = arith.constant 3.200000e+01 : f32
    %10 = vector.broadcast %cst_9 : f32 to vector<8x1xf32>
    %11 = arith.divf %9, %10 : vector<8x1xf32>
    %12 = vector.broadcast %11 : vector<8x1xf32> to vector<8x32xf32>
    %13 = arith.subf %5, %12 : vector<8x32xf32>
    %14 = arith.mulf %13, %13 : vector<8x32xf32>
    %cst_10 = arith.constant dense<0.000000e+00> : vector<8xf32>
    %15 = vector.multi_reduction <add>, %14, %cst_10 [1] : vector<8x32xf32> to vector<8xf32>
    %16 = vector.shape_cast %15 : vector<8xf32> to vector<8x1xf32>
    %cst_11 = arith.constant 3.200000e+01 : f32
    %17 = vector.broadcast %cst_11 : f32 to vector<8x1xf32>
    %18 = arith.divf %16, %17 : vector<8x1xf32>
    %19 = vector.broadcast %11 : vector<8x1xf32> to vector<8x32xf32>
    %20 = arith.subf %5, %19 : vector<8x32xf32>
    %cst_12 = arith.constant 9.99999974E-6 : f32
    %21 = vector.broadcast %cst_12 : f32 to vector<8x1xf32>
    %22 = arith.addf %18, %21 : vector<8x1xf32>
    %23 = math.rsqrt %22 : vector<8x1xf32>
    %24 = vector.broadcast %23 : vector<8x1xf32> to vector<8x32xf32>
    %25 = arith.mulf %20, %24 : vector<8x32xf32>
    %26 = vector.broadcast %6 : vector<1x32xf32> to vector<8x32xf32>
    %27 = arith.mulf %25, %26 : vector<8x32xf32>
    %28 = vector.broadcast %7 : vector<1x32xf32> to vector<8x32xf32>
    %29 = arith.addf %27, %28 : vector<8x32xf32>
    %30 = vector.extract_strided_slice %4 {offsets = [0, 32], sizes = [8, 32], strides = [1, 1]} : vector<8x96xf32> to vector<8x32xf32>
    %c0_13 = arith.constant 0 : index
    %c0_14 = arith.constant 0 : index
    %31 = vector.load %arg5[%c0_13, %c0_14] : memref<1x32xf32, #tpu.memory_space<vmem>>, vector<1x32xf32>
    %c0_15 = arith.constant 0 : index
    %c0_16 = arith.constant 0 : index
    %32 = vector.load %arg6[%c0_15, %c0_16] : memref<1x32xf32, #tpu.memory_space<vmem>>, vector<1x32xf32>
    %cst_17 = arith.constant dense<0.000000e+00> : vector<8xf32>
    %33 = vector.multi_reduction <add>, %30, %cst_17 [1] : vector<8x32xf32> to vector<8xf32>
    %34 = vector.shape_cast %33 : vector<8xf32> to vector<8x1xf32>
    %cst_18 = arith.constant 3.200000e+01 : f32
    %35 = vector.broadcast %cst_18 : f32 to vector<8x1xf32>
    %36 = arith.divf %34, %35 : vector<8x1xf32>
    %37 = vector.broadcast %36 : vector<8x1xf32> to vector<8x32xf32>
    %38 = arith.subf %30, %37 : vector<8x32xf32>
    %39 = arith.mulf %38, %38 : vector<8x32xf32>
    %cst_19 = arith.constant dense<0.000000e+00> : vector<8xf32>
    %40 = vector.multi_reduction <add>, %39, %cst_19 [1] : vector<8x32xf32> to vector<8xf32>
    %41 = vector.shape_cast %40 : vector<8xf32> to vector<8x1xf32>
    %cst_20 = arith.constant 3.200000e+01 : f32
    %42 = vector.broadcast %cst_20 : f32 to vector<8x1xf32>
    %43 = arith.divf %41, %42 : vector<8x1xf32>
    %44 = vector.broadcast %36 : vector<8x1xf32> to vector<8x32xf32>
    %45 = arith.subf %30, %44 : vector<8x32xf32>
    %cst_21 = arith.constant 9.99999974E-6 : f32
    %46 = vector.broadcast %cst_21 : f32 to vector<8x1xf32>
    %47 = arith.addf %43, %46 : vector<8x1xf32>
    %48 = math.rsqrt %47 : vector<8x1xf32>
    %49 = vector.broadcast %48 : vector<8x1xf32> to vector<8x32xf32>
    %50 = arith.mulf %45, %49 : vector<8x32xf32>
    %51 = vector.broadcast %31 : vector<1x32xf32> to vector<8x32xf32>
    %52 = arith.mulf %50, %51 : vector<8x32xf32>
    %53 = vector.broadcast %32 : vector<1x32xf32> to vector<8x32xf32>
    %54 = arith.addf %52, %53 : vector<8x32xf32>
    %55 = vector.extract_strided_slice %4 {offsets = [0, 64], sizes = [8, 32], strides = [1, 1]} : vector<8x96xf32> to vector<8x32xf32>
    %56 = vector.shape_cast %29 : vector<8x32xf32> to vector<1x8x32xf32>
    %57 = vector.shape_cast %54 : vector<8x32xf32> to vector<1x8x32xf32>
    %58 = vector.shape_cast %55 : vector<8x32xf32> to vector<1x8x32xf32>
    %59 = vector.extract_strided_slice %56 {offsets = [0, 0, 0], sizes = [1, 8, 8], strides = [1, 1, 1]} : vector<1x8x32xf32> to vector<1x8x8xf32>
    %60 = arith.truncf %59 : vector<1x8x8xf32> to vector<1x8x8xbf16>
    %61 = vector.extract_strided_slice %57 {offsets = [0, 0, 0], sizes = [1, 8, 8], strides = [1, 1, 1]} : vector<1x8x32xf32> to vector<1x8x8xf32>
    %62 = arith.truncf %61 : vector<1x8x8xf32> to vector<1x8x8xbf16>
    %63 = vector.extract_strided_slice %58 {offsets = [0, 0, 0], sizes = [1, 8, 8], strides = [1, 1, 1]} : vector<1x8x32xf32> to vector<1x8x8xf32>
    %64 = arith.truncf %63 : vector<1x8x8xf32> to vector<1x8x8xbf16>
    %cst_22 = arith.constant dense<0.000000e+00> : vector<1x8x8xf32>
    %65 = tpu.matmul %60, %62, %cst_22 {dimension_numbers = #tpu.dot_dimension_numbers<[2], [2], [1], [1], [0, 0, 0, 1, 1, 1], [0], [0]>} : vector<1x8x8xbf16>, vector<1x8x8xbf16>, vector<1x8x8xf32> -> vector<1x8x8xf32>
    %cst_23 = arith.constant dense<0xFF800000> : vector<1x8xf32>
    %66 = vector.multi_reduction <maximumf>, %65, %cst_23 [2] : vector<1x8x8xf32> to vector<1x8xf32>
    %67 = vector.shape_cast %66 : vector<1x8xf32> to vector<1x8x1xf32>
    %68 = vector.broadcast %67 : vector<1x8x1xf32> to vector<1x8x8xf32>
    %69 = arith.subf %65, %68 : vector<1x8x8xf32>
    %70 = math.exp %69 : vector<1x8x8xf32>
    %cst_24 = arith.constant dense<0.000000e+00> : vector<1x8xf32>
    %71 = vector.multi_reduction <add>, %70, %cst_24 [2] : vector<1x8x8xf32> to vector<1x8xf32>
    %72 = vector.shape_cast %71 : vector<1x8xf32> to vector<1x8x1xf32>
    %73 = tpu.reciprocal %72 {approx = true} : vector<1x8x1xf32> -> vector<1x8x1xf32>
    %74 = vector.broadcast %73 : vector<1x8x1xf32> to vector<1x8x8xf32>
    %75 = arith.mulf %70, %74 : vector<1x8x8xf32>
    %76 = arith.truncf %75 : vector<1x8x8xf32> to vector<1x8x8xbf16>
    %cst_25 = arith.constant dense<0.000000e+00> : vector<1x8x8xf32>
    %77 = tpu.matmul %76, %64, %cst_25 {dimension_numbers = #tpu.dot_dimension_numbers<[2], [1], [1], [2], [0, 0, 0, 1, 1, 2], [0], [0]>} : vector<1x8x8xbf16>, vector<1x8x8xbf16>, vector<1x8x8xf32> -> vector<1x8x8xf32>
    %78 = vector.shape_cast %77 : vector<1x8x8xf32> to vector<8x8xf32>
    %79 = arith.truncf %78 : vector<8x8xf32> to vector<8x8xbf16>
    %c0_26 = arith.constant 0 : index
    %c0_27 = arith.constant 0 : index
    %80 = vector.load %arg10[%c0_26, %c0_27] : memref<8x32xbf16, #tpu.memory_space<vmem>>, vector<8x8xbf16>
    tpu.vector_store %arg10[%c0_26, %c0_27], %79 {strides = array<i32>} : memref<8x32xbf16, #tpu.memory_space<vmem>>, vector<8x8xbf16>,
    %81 = vector.extract_strided_slice %56 {offsets = [0, 0, 8], sizes = [1, 8, 8], strides = [1, 1, 1]} : vector<1x8x32xf32> to vector<1x8x8xf32>
    %82 = arith.truncf %81 : vector<1x8x8xf32> to vector<1x8x8xbf16>
    %83 = vector.extract_strided_slice %57 {offsets = [0, 0, 8], sizes = [1, 8, 8], strides = [1, 1, 1]} : vector<1x8x32xf32> to vector<1x8x8xf32>
    %84 = arith.truncf %83 : vector<1x8x8xf32> to vector<1x8x8xbf16>
    %85 = vector.extract_strided_slice %58 {offsets = [0, 0, 8], sizes = [1, 8, 8], strides = [1, 1, 1]} : vector<1x8x32xf32> to vector<1x8x8xf32>
    %86 = arith.truncf %85 : vector<1x8x8xf32> to vector<1x8x8xbf16>
    %cst_28 = arith.constant dense<0.000000e+00> : vector<1x8x8xf32>
    %87 = tpu.matmul %82, %84, %cst_28 {dimension_numbers = #tpu.dot_dimension_numbers<[2], [2], [1], [1], [0, 0, 0, 1, 1, 1], [0], [0]>} : vector<1x8x8xbf16>, vector<1x8x8xbf16>, vector<1x8x8xf32> -> vector<1x8x8xf32>
    %cst_29 = arith.constant dense<0xFF800000> : vector<1x8xf32>
    %88 = vector.multi_reduction <maximumf>, %87, %cst_29 [2] : vector<1x8x8xf32> to vector<1x8xf32>
    %89 = vector.shape_cast %88 : vector<1x8xf32> to vector<1x8x1xf32>
    %90 = vector.broadcast %89 : vector<1x8x1xf32> to vector<1x8x8xf32>
    %91 = arith.subf %87, %90 : vector<1x8x8xf32>
    %92 = math.exp %91 : vector<1x8x8xf32>
    %cst_30 = arith.constant dense<0.000000e+00> : vector<1x8xf32>
    %93 = vector.multi_reduction <add>, %92, %cst_30 [2] : vector<1x8x8xf32> to vector<1x8xf32>
    %94 = vector.shape_cast %93 : vector<1x8xf32> to vector<1x8x1xf32>
    %95 = tpu.reciprocal %94 {approx = true} : vector<1x8x1xf32> -> vector<1x8x1xf32>
    %96 = vector.broadcast %95 : vector<1x8x1xf32> to vector<1x8x8xf32>
    %97 = arith.mulf %92, %96 : vector<1x8x8xf32>
    %98 = arith.truncf %97 : vector<1x8x8xf32> to vector<1x8x8xbf16>
    %cst_31 = arith.constant dense<0.000000e+00> : vector<1x8x8xf32>
    %99 = tpu.matmul %98, %86, %cst_31 {dimension_numbers = #tpu.dot_dimension_numbers<[2], [1], [1], [2], [0, 0, 0, 1, 1, 2], [0], [0]>} : vector<1x8x8xbf16>, vector<1x8x8xbf16>, vector<1x8x8xf32> -> vector<1x8x8xf32>
    %100 = vector.shape_cast %99 : vector<1x8x8xf32> to vector<8x8xf32>
    %101 = arith.truncf %100 : vector<8x8xf32> to vector<8x8xbf16>
    %c0_32 = arith.constant 0 : index
    %c8 = arith.constant 8 : index
    %102 = vector.load %arg10[%c0_32, %c8] : memref<8x32xbf16, #tpu.memory_space<vmem>>, vector<8x8xbf16>
    tpu.vector_store %arg10[%c0_32, %c8], %101 {strides = array<i32>} : memref<8x32xbf16, #tpu.memory_space<vmem>>, vector<8x8xbf16>,
    %103 = vector.extract_strided_slice %56 {offsets = [0, 0, 16], sizes = [1, 8, 8], strides = [1, 1, 1]} : vector<1x8x32xf32> to vector<1x8x8xf32>
    %104 = arith.truncf %103 : vector<1x8x8xf32> to vector<1x8x8xbf16>
    %105 = vector.extract_strided_slice %57 {offsets = [0, 0, 16], sizes = [1, 8, 8], strides = [1, 1, 1]} : vector<1x8x32xf32> to vector<1x8x8xf32>
    %106 = arith.truncf %105 : vector<1x8x8xf32> to vector<1x8x8xbf16>
    %107 = vector.extract_strided_slice %58 {offsets = [0, 0, 16], sizes = [1, 8, 8], strides = [1, 1, 1]} : vector<1x8x32xf32> to vector<1x8x8xf32>
    %108 = arith.truncf %107 : vector<1x8x8xf32> to vector<1x8x8xbf16>
    %cst_33 = arith.constant dense<0.000000e+00> : vector<1x8x8xf32>
    %109 = tpu.matmul %104, %106, %cst_33 {dimension_numbers = #tpu.dot_dimension_numbers<[2], [2], [1], [1], [0, 0, 0, 1, 1, 1], [0], [0]>} : vector<1x8x8xbf16>, vector<1x8x8xbf16>, vector<1x8x8xf32> -> vector<1x8x8xf32>
    %cst_34 = arith.constant dense<0xFF800000> : vector<1x8xf32>
    %110 = vector.multi_reduction <maximumf>, %109, %cst_34 [2] : vector<1x8x8xf32> to vector<1x8xf32>
    %111 = vector.shape_cast %110 : vector<1x8xf32> to vector<1x8x1xf32>
    %112 = vector.broadcast %111 : vector<1x8x1xf32> to vector<1x8x8xf32>
    %113 = arith.subf %109, %112 : vector<1x8x8xf32>
    %114 = math.exp %113 : vector<1x8x8xf32>
    %cst_35 = arith.constant dense<0.000000e+00> : vector<1x8xf32>
    %115 = vector.multi_reduction <add>, %114, %cst_35 [2] : vector<1x8x8xf32> to vector<1x8xf32>
    %116 = vector.shape_cast %115 : vector<1x8xf32> to vector<1x8x1xf32>
    %117 = tpu.reciprocal %116 {approx = true} : vector<1x8x1xf32> -> vector<1x8x1xf32>
    %118 = vector.broadcast %117 : vector<1x8x1xf32> to vector<1x8x8xf32>
    %119 = arith.mulf %114, %118 : vector<1x8x8xf32>
    %120 = arith.truncf %119 : vector<1x8x8xf32> to vector<1x8x8xbf16>
    %cst_36 = arith.constant dense<0.000000e+00> : vector<1x8x8xf32>
    %121 = tpu.matmul %120, %108, %cst_36 {dimension_numbers = #tpu.dot_dimension_numbers<[2], [1], [1], [2], [0, 0, 0, 1, 1, 2], [0], [0]>} : vector<1x8x8xbf16>, vector<1x8x8xbf16>, vector<1x8x8xf32> -> vector<1x8x8xf32>
    %122 = vector.shape_cast %121 : vector<1x8x8xf32> to vector<8x8xf32>
    %123 = arith.truncf %122 : vector<8x8xf32> to vector<8x8xbf16>
    %c0_37 = arith.constant 0 : index
    %c16 = arith.constant 16 : index
    %124 = vector.load %arg10[%c0_37, %c16] : memref<8x32xbf16, #tpu.memory_space<vmem>>, vector<8x8xbf16>
    tpu.vector_store %arg10[%c0_37, %c16], %123 {strides = array<i32>} : memref<8x32xbf16, #tpu.memory_space<vmem>>, vector<8x8xbf16>,
    %125 = vector.extract_strided_slice %56 {offsets = [0, 0, 24], sizes = [1, 8, 8], strides = [1, 1, 1]} : vector<1x8x32xf32> to vector<1x8x8xf32>
    %126 = arith.truncf %125 : vector<1x8x8xf32> to vector<1x8x8xbf16>
    %127 = vector.extract_strided_slice %57 {offsets = [0, 0, 24], sizes = [1, 8, 8], strides = [1, 1, 1]} : vector<1x8x32xf32> to vector<1x8x8xf32>
    %128 = arith.truncf %127 : vector<1x8x8xf32> to vector<1x8x8xbf16>
    %129 = vector.extract_strided_slice %58 {offsets = [0, 0, 24], sizes = [1, 8, 8], strides = [1, 1, 1]} : vector<1x8x32xf32> to vector<1x8x8xf32>
    %130 = arith.truncf %129 : vector<1x8x8xf32> to vector<1x8x8xbf16>
    %cst_38 = arith.constant dense<0.000000e+00> : vector<1x8x8xf32>
    %131 = tpu.matmul %126, %128, %cst_38 {dimension_numbers = #tpu.dot_dimension_numbers<[2], [2], [1], [1], [0, 0, 0, 1, 1, 1], [0], [0]>} : vector<1x8x8xbf16>, vector<1x8x8xbf16>, vector<1x8x8xf32> -> vector<1x8x8xf32>
    %cst_39 = arith.constant dense<0xFF800000> : vector<1x8xf32>
    %132 = vector.multi_reduction <maximumf>, %131, %cst_39 [2] : vector<1x8x8xf32> to vector<1x8xf32>
    %133 = vector.shape_cast %132 : vector<1x8xf32> to vector<1x8x1xf32>
    %134 = vector.broadcast %133 : vector<1x8x1xf32> to vector<1x8x8xf32>
    %135 = arith.subf %131, %134 : vector<1x8x8xf32>
    %136 = math.exp %135 : vector<1x8x8xf32>
    %cst_40 = arith.constant dense<0.000000e+00> : vector<1x8xf32>
    %137 = vector.multi_reduction <add>, %136, %cst_40 [2] : vector<1x8x8xf32> to vector<1x8xf32>
    %138 = vector.shape_cast %137 : vector<1x8xf32> to vector<1x8x1xf32>
    %139 = tpu.reciprocal %138 {approx = true} : vector<1x8x1xf32> -> vector<1x8x1xf32>
    %140 = vector.broadcast %139 : vector<1x8x1xf32> to vector<1x8x8xf32>
    %141 = arith.mulf %136, %140 : vector<1x8x8xf32>
    %142 = arith.truncf %141 : vector<1x8x8xf32> to vector<1x8x8xbf16>
    %cst_41 = arith.constant dense<0.000000e+00> : vector<1x8x8xf32>
    %143 = tpu.matmul %142, %130, %cst_41 {dimension_numbers = #tpu.dot_dimension_numbers<[2], [1], [1], [2], [0, 0, 0, 1, 1, 2], [0], [0]>} : vector<1x8x8xbf16>, vector<1x8x8xbf16>, vector<1x8x8xf32> -> vector<1x8x8xf32>
    %144 = vector.shape_cast %143 : vector<1x8x8xf32> to vector<8x8xf32>
    %145 = arith.truncf %144 : vector<8x8xf32> to vector<8x8xbf16>
    %c0_42 = arith.constant 0 : index
    %c24 = arith.constant 24 : index
    %146 = vector.load %arg10[%c0_42, %c24] : memref<8x32xbf16, #tpu.memory_space<vmem>>, vector<8x8xbf16>
    tpu.vector_store %arg10[%c0_42, %c24], %145 {strides = array<i32>} : memref<8x32xbf16, #tpu.memory_space<vmem>>, vector<8x8xbf16>,
    %c0_43 = arith.constant 0 : index
    %c0_44 = arith.constant 0 : index
    %147 = vector.load %arg10[%c0_43, %c0_44] : memref<8x32xbf16, #tpu.memory_space<vmem>>, vector<8x32xbf16>
    %c0_45 = arith.constant 0 : index
    %c0_46 = arith.constant 0 : index
    %148 = vector.load %arg7[%c0_45, %c0_46] : memref<32x32xbf16, #tpu.memory_space<vmem>>, vector<32x32xbf16>
    %cst_47 = arith.constant dense<0.000000e+00> : vector<8x32xf32>
    %149 = tpu.matmul %147, %148, %cst_47 {dimension_numbers = #tpu.dot_dimension_numbers<[1], [0], [0], [1], [0, 0, 1, 1], [], []>} : vector<8x32xbf16>, vector<32x32xbf16>, vector<8x32xf32> -> vector<8x32xf32>
    %c0_48 = arith.constant 0 : index
    %c0_49 = arith.constant 0 : index
    %150 = vector.load %arg8[%c0_48, %c0_49] : memref<1x32xf32, #tpu.memory_space<vmem>>, vector<1x32xf32>
    %151 = vector.broadcast %150 : vector<1x32xf32> to vector<8x32xf32>
    %152 = arith.addf %149, %151 : vector<8x32xf32>
    %153 = vector.shape_cast %152 : vector<8x32xf32> to vector<1x8x32xf32>
    %c0_50 = arith.constant 0 : index
    %c0_51 = arith.constant 0 : index
    %c0_52 = arith.constant 0 : index
    %154 = vector.load %arg9[%c0_50, %c0_51, %c0_52] : memref<1x8x32xf32, #tpu.memory_space<vmem>>, vector<1x8x32xf32>
    tpu.vector_store %arg9[%c0_50, %c0_51, %c0_52], %153 {strides = array<i32>} : memref<1x8x32xf32, #tpu.memory_space<vmem>>, vector<1x8x32xf32>,
    return
  }
  func.func @transform_0(%arg0: i32) -> (i32, i32, i32) {
    %c0_i32 = arith.constant 0 : i32
    %c0_i32_0 = arith.constant 0 : i32
    %c0_i32_1 = arith.constant 0 : i32
    return %arg0, %c0_i32, %c0_i32_0 : i32, i32, i32
  }
  func.func @transform_1(%arg0: i32) -> (i32, i32) {
    %c0_i32 = arith.constant 0 : i32
    %c0_i32_0 = arith.constant 0 : i32
    %c0_i32_1 = arith.constant 0 : i32
    return %c0_i32, %c0_i32_0 : i32, i32
  }
  func.func @transform_2(%arg0: i32) -> (i32, i32) {
    %c0_i32 = arith.constant 0 : i32
    %c0_i32_0 = arith.constant 0 : i32
    %c0_i32_1 = arith.constant 0 : i32
    return %c0_i32, %c0_i32_0 : i32, i32
  }
  func.func @transform_3(%arg0: i32) -> (i32, i32) {
    %c0_i32 = arith.constant 0 : i32
    %c0_i32_0 = arith.constant 0 : i32
    %c0_i32_1 = arith.constant 0 : i32
    return %c0_i32, %c0_i32_0 : i32, i32
  }
  func.func @transform_4(%arg0: i32) -> (i32, i32) {
    %c0_i32 = arith.constant 0 : i32
    %c0_i32_0 = arith.constant 0 : i32
    %c0_i32_1 = arith.constant 0 : i32
    return %c0_i32, %c0_i32_0 : i32, i32
  }
  func.func @transform_5(%arg0: i32) -> (i32, i32) {
    %c0_i32 = arith.constant 0 : i32
    %c0_i32_0 = arith.constant 0 : i32
    %c0_i32_1 = arith.constant 0 : i32
    return %c0_i32, %c0_i32_0 : i32, i32
  }
  func.func @transform_6(%arg0: i32) -> (i32, i32) {
    %c0_i32 = arith.constant 0 : i32
    %c0_i32_0 = arith.constant 0 : i32
    %c0_i32_1 = arith.constant 0 : i32
    return %c0_i32, %c0_i32_0 : i32, i32
  }
  func.func @transform_7(%arg0: i32) -> (i32, i32) {
    %c0_i32 = arith.constant 0 : i32
    %c0_i32_0 = arith.constant 0 : i32
    %c0_i32_1 = arith.constant 0 : i32
    return %c0_i32, %c0_i32_0 : i32, i32
  }
  func.func @transform_8(%arg0: i32) -> (i32, i32, i32) {
    %c0_i32 = arith.constant 0 : i32
    %c0_i32_0 = arith.constant 0 : i32
    %c0_i32_1 = arith.constant 0 : i32
    return %arg0, %c0_i32, %c0_i32_0 : i32, i32, i32
  }
}

</mosaic_0001>

<bundles_post_ra>
// kernel: tpu_custom_call.1
= control target key start
LH: loop header
LB: loop body
LE: loop exit
PB: predicated region body
PF: predicated region fallthrough
CT: control target
= control target key end

     0   :  { %13 = vsyncpa [#allocation4], 0  ;;  %s2344_s0 = inlined_call_operand.hbm [shape: f32[2,8,32], index: 0, kind: input, shape index: {}]   ;;  %s2345_s1 = inlined_call_operand.hbm [shape: bf16[32,96], index: 1, kind: input, shape index: {}]   ;;  %s2346_s2 = inlined_call_operand.hbm [shape: f32[1,32], index: 2, kind: input, shape index: {}]   ;;  %s2347_s3 = inlined_call_operand.hbm [shape: f32[1,32], index: 3, kind: input, shape index: {}]   ;;  %s2348_s4 = inlined_call_operand.hbm [shape: f32[1,32], index: 4, kind: input, shape index: {}]   ;;  %s2349_s5 = inlined_call_operand.hbm [shape: f32[1,32], index: 5, kind: input, shape index: {}]   ;;  %s2350_s6 = inlined_call_operand.hbm [shape: bf16[32,32], index: 6, kind: input, shape index: {}]   ;;  %s2351_s7 = inlined_call_operand.hbm [shape: f32[1,32], index: 7, kind: input, shape index: {}]   ;;  %s2352_s8 = inlined_call_operand.hbm [shape: f32[2,8,32], index: 8, kind: output, shape index: {}]  }
   0x1   :  { %15 = vsyncpa [#allocation4 + $0x1], 0 }
   0x2   :  { %16 = vsyncpa [#allocation7], 0 }
   0x3   :  { %17 = vsyncpa [#allocation10], 0 }
   0x4   :  { %18 = vsyncpa [#allocation13], 0 }
   0x5   :  { %19 = vsyncpa [#allocation16], 0 }
   0x6   :  { %20 = vsyncpa [#allocation5], 0 }
   0x7   :  { %22 = vsyncpa [#allocation5 + $0x1], 0  ;;  %s1922_s27 = smov 0   ;;  %s1924_s28 = smov 0  }
   0x8   :  { %s1926_s29 = smov 0   ;;  %s1928_s30 = smov 0  }
   0x9 LB: > { %s1849_s9 = smov [#allocation6]   ;;  %s1943_s11 = sadd.s32 4294967295, %s1847_s30   ;;  %s1847_s30 = sphi %s1928_s30, %s2381_s30   ;;  %s1843_s29 = sphi %s1926_s29, %s2380_s29   ;;  %s1839_s28 = sphi %s1924_s28, %s2379_s28   ;;  %s1835_s27 = sphi %s1922_s27, %s2378_s27  }
   0xa   : > { %s244_s10 = sshll.u32 %s1849_s9, 4  ;;  %p1243_p0 = scmp.ge.s32.totalorder %s1847_s30, 1  ;;  %s1948_s10 = int_to_ptr.vmem [resolvable:$true] %s244_s10 }
   0xb   : > { %p2354_p1 = scmp.eq.s32.totalorder %s1943_s11, 0  ;;  %p232_p2 = scmp.lt.s32.totalorder %s1847_s30, 3 }
   0xc   : > { %s1850_s13 = smov [#allocation9]   ;;  %s1851_s16 = smov [#allocation12]  }
   0xd   : > { %p1950_p3 = pnand %p1243_p0, %p232_p2  ;;  %s269_s14 = sshll.u32 %s1850_s13, 4  ;;  %s1963_s14 = int_to_ptr.vmem [resolvable:$true] %s269_s14 }
   0xe   : > { %s291_s17 = sshll.u32 %s1851_s16, 4  ;;  %s1539_s20 = scalar_lea.hbm %s2345_s1, 256  ;;  %s1965_s17 = int_to_ptr.vmem [resolvable:$true] %s291_s17 }
   0xf   : > { %s2357_s12 = scalar_select %p1950_p3, 1, 0 }
  0x10   : > { %p1411_p5 = pneg %p1950_p3  ;;  %p1540_p7 = scmp.ne.s32.totalorder %s2345_s1, %s1539_s20 }
  0x11   : > { %p1546_p11 = scmp.lt.u32.totalorder %s1539_s20, %s2345_s1 }
  0x12   : > { %p1959_p6 = pnand %p1411_p5, %p2354_p1 }
  0x14   : > { %p1975_p8 = pneg %p1959_p6 }
  0x16   : > { %p1542_p9 = pnand %p1975_p8, %p1540_p7 }
  0x18   : > { %p1543_p10 = pneg %p1542_p9 }
  0x1a   : > { %p1548_p12 = pnand %p1546_p11, %p1543_p10 }
  0x1c   : > { %1551 = shalt.err (!%p1548_p12)
}
  0x1d   : > { %s1552_s26 = scalar_lea.vmem %s1948_s10, 256  ;;  %p1560_p5 = scmp.lt.s32.totalorder %s1948_s10, %s1948_s10 }
  0x1e   : > { %p1553_p13 = scmp.ne.s32.totalorder %s1948_s10, %s1552_s26  ;;  %p1561_p4 = scmp.lt.s32.totalorder %s1552_s26, %s1552_s26 }
  0x20   : > { %p1555_p0 = pnand %p1553_p13, %p1975_p8  ;;  %p1562_p7 = por %p1561_p4, %p1560_p5 }
  0x22   : > { %p1556_p2 = pneg %p1555_p0 }
  0x24   : > { %p1563_p9 = pnand %p1562_p7, %p1556_p2 }
  0x26   : > { %1566 = shalt.err (!%p1563_p9)
}
  0x27   : > { %s2353_s9 = smov 64   ;;  %s1853_s13 = smov 4  }
  0x28   : > { %1414 = dma.hbm_to_vmem [thread:$0]  (!%p1959_p6), %s2345_s1, 256, %s1948_s10, [#allocation7], %s2353_s9, %s2353_s9, %s1853_s13  }
  0x29   : > { %s1567_s21 = scalar_lea.hbm %s2347_s3, 16 }
  0x2a   : > { %p1568_p4 = scmp.ne.s32.totalorder %s2347_s3, %s1567_s21  ;;  %p1574_p12 = scmp.lt.u32.totalorder %s1567_s21, %s2347_s3 }
  0x2c   : > { %p1570_p10 = pnand %p1568_p4, %p1975_p8 }
  0x2e   : > { %p1571_p11 = pneg %p1570_p10 }
  0x30   : > { %p1576_p13 = pnand %p1574_p12, %p1571_p11 }
  0x32   : > { %1579 = shalt.err (!%p1576_p13)
}
  0x33   : > { %s1580_s10 = scalar_lea.vmem %s1963_s14, 16  ;;  %s1587_s16 = scalar_lea.vmem %s1963_s14, 32 }
  0x34   : > { %p1581_p0 = scmp.ne.s32.totalorder %s1963_s14, %s1580_s10  ;;  %p1588_p7 = scmp.lt.s32.totalorder %s1963_s14, %s1963_s14 }
  0x35   : > { %p1589_p9 = scmp.lt.s32.totalorder %s1587_s16, %s1580_s10 }
  0x36   : > { %p1583_p2 = pnand %p1581_p0, %p1975_p8 }
  0x37   : > { %p1590_p4 = por %p1589_p9, %p1588_p7 }
  0x38   : > { %p1584_p5 = pneg %p1583_p2 }
  0x3a   : > { %p1591_p10 = pnand %p1590_p4, %p1584_p5 }
  0x3c   : > { %1594 = shalt.err (!%p1591_p10)
}
  0x3d   : > { %1420 = dma.hbm_to_vmem [thread:$0]  (!%p1959_p6), %s2347_s3, 16, %s1963_s14, [#allocation10]  }
  0x3e   : > { %s1595_s22 = scalar_lea.hbm %s2349_s5, 16 }
  0x3f   : > { %p1596_p11 = scmp.ne.s32.totalorder %s2349_s5, %s1595_s22  ;;  %p1602_p0 = scmp.lt.u32.totalorder %s1595_s22, %s2349_s5 }
  0x41   : > { %p1598_p12 = pnand %p1596_p11, %p1975_p8 }
  0x43   : > { %p1599_p13 = pneg %p1598_p12 }
  0x45   : > { %p1604_p2 = pnand %p1602_p0, %p1599_p13 }
  0x47   : > { %1607 = shalt.err (!%p1604_p2)
}
  0x48   : > { %s1608_s14 = scalar_lea.vmem %s1965_s17, 16  ;;  %s1615_s16 = scalar_lea.vmem %s1965_s17, 32 }
  0x49   : > { %p1609_p5 = scmp.ne.s32.totalorder %s1965_s17, %s1608_s14  ;;  %p1616_p4 = scmp.lt.s32.totalorder %s1965_s17, %s1965_s17 }
  0x4a   : > { %p1617_p10 = scmp.lt.s32.totalorder %s1615_s16, %s1608_s14 }
  0x4b   : > { %p1611_p7 = pnand %p1609_p5, %p1975_p8 }
  0x4c   : > { %p1618_p11 = por %p1617_p10, %p1616_p4 }
  0x4d   : > { %p1612_p9 = pneg %p1611_p7 }
  0x4f   : > { %p1619_p12 = pnand %p1618_p11, %p1612_p9 }
  0x51   : > { %1622 = shalt.err (!%p1619_p12)
}
  0x52   : > { %1426 = dma.hbm_to_vmem [thread:$0]  (!%p1959_p6), %s2349_s5, 16, %s1965_s17, [#allocation13]  }
  0x53   : > { %s1854_s20 = smov [#allocation8]   ;;  %s1855_s22 = smov [#allocation11]  }
  0x54   : > { %s258_s21 = sshll.u32 %s1854_s20, 4  ;;  %s280_s24 = sshll.u32 %s1855_s22, 4  ;;  %s259_s21 = int_to_ptr.vmem [resolvable:$true] %s258_s21  ;;  %s281_s24 = int_to_ptr.vmem [resolvable:$true] %s280_s24 }
  0x55   : > { %s1623_s10 = scalar_lea.hbm %s2346_s2, 16 }
  0x56   : > { %p1624_p13 = scmp.ne.s32.totalorder %s2346_s2, %s1623_s10  ;;  %p1630_p5 = scmp.lt.u32.totalorder %s1623_s10, %s2346_s2 }
  0x58   : > { %p1626_p0 = pnand %p1624_p13, %p1975_p8 }
  0x5a   : > { %p1627_p2 = pneg %p1626_p0 }
  0x5c   : > { %p1632_p7 = pnand %p1630_p5, %p1627_p2 }
  0x5e   : > { %1635 = shalt.err (!%p1632_p7)
}
  0x5f   : > { %s1636_s17 = scalar_lea.vmem %s259_s21, 16  ;;  %s1643_s19 = scalar_lea.vmem %s259_s21, 32 }
  0x60   : > { %p1637_p9 = scmp.ne.s32.totalorder %s259_s21, %s1636_s17  ;;  %p1644_p11 = scmp.lt.s32.totalorder %s259_s21, %s259_s21 }
  0x61   : > { %p1645_p12 = scmp.lt.s32.totalorder %s1643_s19, %s1636_s17 }
  0x62   : > { %p1639_p4 = pnand %p1637_p9, %p1975_p8 }
  0x63   : > { %p1646_p1 = por %p1645_p12, %p1644_p11 }
  0x64   : > { %p1640_p10 = pneg %p1639_p4 }
  0x66   : > { %p1647_p3 = pnand %p1646_p1, %p1640_p10 }
  0x68   : > { %1650 = shalt.err (!%p1647_p3)
}
  0x69   : > { %1417 = dma.hbm_to_vmem [thread:$0]  (!%p1959_p6), %s2346_s2, 16, %s259_s21, [#allocation7]  }
  0x6a   : > { %s1651_s26 = scalar_lea.hbm %s2348_s4, 16 }
  0x6b   : > { %p1652_p13 = scmp.ne.s32.totalorder %s2348_s4, %s1651_s26  ;;  %p1658_p3 = scmp.lt.u32.totalorder %s1651_s26, %s2348_s4 }
  0x6d   : > { %p1654_p0 = pnand %p1652_p13, %p1975_p8 }
  0x6f   : > { %p1655_p1 = pneg %p1654_p0 }
  0x71   : > { %p1660_p2 = pnand %p1658_p3, %p1655_p1 }
  0x73   : > { %1663 = shalt.err (!%p1660_p2)
}
  0x74   : > { %s1664_s17 = scalar_lea.vmem %s281_s24, 16  ;;  %s1671_s21 = scalar_lea.vmem %s281_s24, 32 }
  0x75   : > { %p1665_p5 = scmp.ne.s32.totalorder %s281_s24, %s1664_s17  ;;  %p1672_p4 = scmp.lt.s32.totalorder %s281_s24, %s281_s24 }
  0x76   : > { %p1673_p10 = scmp.lt.s32.totalorder %s1671_s21, %s1664_s17 }
  0x77   : > { %p1667_p7 = pnand %p1665_p5, %p1975_p8 }
  0x78   : > { %p1674_p11 = por %p1673_p10, %p1672_p4 }
  0x79   : > { %p1668_p9 = pneg %p1667_p7 }
  0x7b   : > { %p1675_p12 = pnand %p1674_p11, %p1668_p9 }
  0x7d   : > { %1678 = shalt.err (!%p1675_p12)
}
  0x7e   : > { %1423 = dma.hbm_to_vmem [thread:$0]  (!%p1959_p6), %s2348_s4, 16, %s281_s24, [#allocation10]  }
  0x7f   : > { %s1856_s22 = smov [#allocation14]   ;;  %s1857_s25 = smov [#allocation15]  }
  0x80   : > { %s301_s9 = sshll.u32 %s1856_s22, 4  ;;  %s315_s26 = sshll.u32 %s1857_s25, 4  ;;  %s302_s9 = int_to_ptr.vmem [resolvable:$true] %s301_s9  ;;  %s316_s26 = int_to_ptr.vmem [resolvable:$true] %s315_s26 }
  0x81   : > { %s1679_s16 = scalar_lea.hbm %s2350_s6, 256 }
  0x82   : > { %p1680_p13 = scmp.ne.s32.totalorder %s2350_s6, %s1679_s16  ;;  %p1686_p3 = scmp.lt.u32.totalorder %s1679_s16, %s2350_s6 }
  0x84   : > { %p1682_p0 = pnand %p1680_p13, %p1975_p8 }
  0x86   : > { %p1683_p1 = pneg %p1682_p0 }
  0x88   : > { %p1688_p2 = pnand %p1686_p3, %p1683_p1 }
  0x8a   : > { %1691 = shalt.err (!%p1688_p2)
}
  0x8b   : > { %s1692_s24 = scalar_lea.vmem %s302_s9, 256  ;;  %p1700_p4 = scmp.lt.s32.totalorder %s302_s9, %s302_s9 }
  0x8c   : > { %p1693_p5 = scmp.ne.s32.totalorder %s302_s9, %s1692_s24  ;;  %p1701_p10 = scmp.lt.s32.totalorder %s1692_s24, %s1692_s24 }
  0x8e   : > { %p1695_p7 = pnand %p1693_p5, %p1975_p8  ;;  %p1702_p11 = por %p1701_p10, %p1700_p4 }
  0x90   : > { %p1696_p9 = pneg %p1695_p7 }
  0x92   : > { %p1703_p12 = pnand %p1702_p11, %p1696_p9 }
  0x94   : > { %1706 = shalt.err (!%p1703_p12)
}
  0x95   : > { %s2360_s20 = smov 64   ;;  %s1707_s16 = scalar_lea.hbm %s2351_s7, 16 }
  0x96   : > { %1429 = dma.hbm_to_vmem [thread:$0]  (!%p1959_p6), %s2350_s6, 256, %s302_s9, [#allocation13], %s2360_s20, %s2360_s20, %s1853_s13  }
  0x97   : > { %p1708_p13 = scmp.ne.s32.totalorder %s2351_s7, %s1707_s16  ;;  %p1714_p3 = scmp.lt.u32.totalorder %s1707_s16, %s2351_s7 }
  0x99   : > { %p1710_p0 = pnand %p1708_p13, %p1975_p8 }
  0x9b   : > { %p1711_p1 = pneg %p1710_p0 }
  0x9d   : > { %p1716_p2 = pnand %p1714_p3, %p1711_p1 }
  0x9f   : > { %1719 = shalt.err (!%p1716_p2)
}
  0xa0   : > { %s1720_s24 = scalar_lea.vmem %s316_s26, 16  ;;  %s1727_s13 = scalar_lea.vmem %s316_s26, 32 }
  0xa1   : > { %p1721_p5 = scmp.ne.s32.totalorder %s316_s26, %s1720_s24  ;;  %p1728_p4 = scmp.lt.s32.totalorder %s316_s26, %s316_s26 }
  0xa2   : > { %p1729_p10 = scmp.lt.s32.totalorder %s1727_s13, %s1720_s24 }
  0xa3   : > { %p1723_p7 = pnand %p1721_p5, %p1975_p8 }
  0xa4   : > { %p1730_p11 = por %p1729_p10, %p1728_p4 }
  0xa5   : > { %p1724_p9 = pneg %p1723_p7 }
  0xa7   : > { %p1731_p12 = pnand %p1730_p11, %p1724_p9 }
  0xa9   : > { %1734 = shalt.err (!%p1731_p12)
}
  0xaa   : > { %1432 = dma.hbm_to_vmem [thread:$0]  (!%p1959_p6), %s2351_s7, 16, %s316_s26, [#allocation16]  }
  0xab   : > { %s1242_s23 = sadd.s32 4294967294, %s1847_s30   ;;  %s2124_s15 = sadd.s32 1, %s1847_s30  }
  0xac   : > { %s35_s22 = sadd.s32 1, %s1843_s29  ;;  %s32_s25 = ssub.s32 %s1847_s30, %s2124_s15 }
  0xad   : > { %p42_p8 = scmp.ne.s32.totalorder %s1843_s29, %s1839_s28  ;;  %p33_p13 = scmp.eq.s32.totalorder %s32_s25, 0 }
  0xae   : > { %p43_p0 = scmp.eq.s32.totalorder %s1847_s30, 0  ;;  %p48_p1 = scmp.ne.s32.totalorder %s1839_s28, %s1835_s27 }
  0xaf   : > { %p219_p3 = scmp.eq.s32.totalorder %s1943_s11, 1  ;;  %p2361_p5 = scmp.eq.s32.totalorder %s1943_s11, 0 }
  0xb0   : > { %s2136_s10 = scalar_select %p33_p13, %s1843_s29, %s35_s22  }
  0xb1   : > { %p44_p2 = por %p43_p0, %p42_p8  ;;  %p2140_p7 = por %p2361_p5, %p48_p1 }
  0xb2   : > { %p2144_p6 = por %p219_p3, %p42_p8  ;;  %p225_p9 = scmp.eq.s32.totalorder %s1242_s23, 1 }
  0xb3   : > { %p1448_p4 = scmp.lt.s32.totalorder %s1847_s30, 2  ;;  %s326_s16 = sand.u32 1, %s1843_s29  }
  0xb4   : > { %s2363_s26 = scalar_select %p2144_p6, 1, 0 }
  0xb5   : > { %p2150_p10 = por %p225_p9, %p48_p1  ;;  %s1252_s17 = sshll.u32 %s326_s16, 3 }
  0xb6   : > { %s1253_s21 = sshll.u32 %s1847_s30, 7  ;;  %s330_s9 = scalar_lea.vmem [#allocation3], %s1252_s17 }
  0xb7   : > { %s2364_s18 = scalar_select %p2150_p10, 1, 0 }
  0xb8   : > { %s2158_s13 = scalar_lea.hbm %s2344_s0, %s1253_s21  ;;  %s337_s20 = sshll.u32 %s330_s9, 4  ;;  %s2164_s20 = int_to_ptr.vmem [resolvable:$true] %s337_s20 }
  0xb9   : > { %p2160_p11 = pnand %p1448_p4, %p44_p2  ;;  %s327_s22 = scalar_lea.sflag [#allocation4], %s326_s16 }
  0xba   : > { %s1735_s25 = scalar_lea.hbm %s2158_s13, 128  ;;  %s1740_s19 = scalar_lea.hbm %s2344_s0, 256 }
  0xbb   : > { %p1736_p12 = scmp.ne.s32.totalorder %s2158_s13, %s1735_s25  ;;  %p1737_p8 = pneg %p2160_p11 }
  0xbc   : > { %p1741_p1 = scmp.lt.u32.totalorder %s2158_s13, %s2344_s0  ;;  %p1742_p3 = scmp.lt.u32.totalorder %s1740_s19, %s1735_s25 }
  0xbd   : > { %p1738_p13 = pnand %p1737_p8, %p1736_p12  ;;  %p1744_p5 = scmp.lt.u32.totalorder %s1735_s25, %s2158_s13 }
  0xbe   : > { %p1743_p2 = por %p1742_p3, %p1741_p1 }
  0xbf   : > { %p1739_p0 = pneg %p1738_p13 }
  0xc0   : > { %p1745_p9 = por %p1744_p5, %p1743_p2 }
  0xc2   : > { %p1746_p4 = pnand %p1745_p9, %p1739_p0 }
  0xc4   : > { %1749 = shalt.err (!%p1746_p4)
}
  0xc5   : > { %s1750_s16 = scalar_lea.vmem %s2164_s20, 128  ;;  %s1858_s21 = smov [#allocation3]  }
  0xc6   : > { %p1751_p12 = scmp.ne.s32.totalorder %s2164_s20, %s1750_s16  ;;  %s1755_s17 = sshll.u32 %s1858_s21, 4  ;;  %s1756_s17 = int_to_ptr.vmem [resolvable:$false] %s1755_s17 }
  0xc7   : > { %s1757_s24 = scalar_lea.vmem %s1756_s17, 256  ;;  %p1758_p6 = scmp.lt.s32.totalorder %s2164_s20, %s1756_s17 }
  0xc8   : > { %p1753_p13 = pnand %p1751_p12, %p1737_p8  ;;  %p1759_p1 = scmp.lt.s32.totalorder %s1757_s24, %s1750_s16 }
  0xca   : > { %p1754_p10 = pneg %p1753_p13  ;;  %p1760_p3 = por %p1759_p1, %p1758_p6 }
  0xcc   : > { %p1761_p2 = pnand %p1760_p3, %p1754_p10 }
  0xce   : > { %1764 = shalt.err (!%p1761_p2)
}
  0xcf   : > { %1436 = dma.hbm_to_vmem [thread:$0]  (!%p2160_p11), %s2158_s13, 128, %s2164_s20, %s327_s22  }
  0xd0   : > { %p2366_p0 = scmp.ne.s32.totalorder %s2357_s12, 0 }
  0xd1   : > { %s2194_s25 = sand.u32 (!%p2366_p0), 1, %s1839_s28  }
  0xd2   : > { %346 = sbr.rel (%p2366_p0) target bundleno = 2274 (0x8e2), region = 52  ;;  %s1255_s19 = sshll.u32 (!%p2366_p0), %s2194_s25, 3 }
  0xd3   : > { %s349_s9 = scalar_lea.sflag (!%p2366_p0), [#allocation4], %s2194_s25  ;;  %s352_s16 = scalar_lea.vmem (!%p2366_p0), [#allocation3], %s1255_s19 }
  0xd9   : > { %1810 = dma.done.wait (%p2140_p7), %s349_s9, 128  }
  0xda   : > { %1812 = vsyncadd (%p2140_p7), %s349_s9, 4294967168  ;;  %p2367_p6 = scmp.eq.s32.totalorder %s1943_s11, 0 }
  0xdc   : > { %1814 = dma.done.wait (%p2367_p6), [#allocation7], 272   ;;  %p2368_p10 = pmov %p2367_p6 }
  0xdd   : > { %p2369_p11 = pmov %p2367_p6 }
  0xde   : > { %1816 = vsyncadd (%p2368_p10), [#allocation7], 4294967024 }
  0xdf   : > { %1818 = dma.done.wait (%p2369_p11), [#allocation10], 32   ;;  %p2370_p8 = pmov %p2367_p6 }
  0xe0   : > { %p2371_p5 = pmov %p2367_p6 }
  0xe1   : > { %1820 = vsyncadd (%p2370_p8), [#allocation10], 4294967264 }
  0xe2   : > { %1822 = dma.done.wait (%p2371_p5), [#allocation13], 272   ;;  %p2372_p9 = pmov %p2371_p5 }
  0xe3   : > { %p2373_p7 = pmov %p2371_p5 }
  0xe4   : > { %1824 = vsyncadd (%p2372_p9), [#allocation13], 4294967024 }
  0xe5   : > { %1826 = dma.done.wait (%p2373_p7), [#allocation16], 16   ;;  %p2374_p4 = pmov %p2371_p5 }
  0xe6   : > { %v1859_v0 = vmov 0.0   ;;  %vm1860_vm0 = vmmov 0   ;;  %v1515_v1 = vld [vmem:[#allocation6] sm:$0xff]   ;;  %v1516_v2 = vld [vmem:[#allocation6 + $0x8] sm:$0xff]   ;;  %v414_v3 = vld [vmem:[%s352_s16] sm:$0xff]  ;;  %vm432_vm1 = vcmask 261120  }
  0xe7   : > { %1828 = vsyncadd (%p2374_p4), [#allocation16], 4294967280  ;;  %1315 = vmatprep.subr.bf16.mxu0 %v1859_v0  ;;  %1319 = vmatprep.mubr.msk.bf16.mxu0 %vm1860_vm0, %v1859_v0  ;;  %v415_v4 = vpack.c.bf16 %v414_v3, %v414_v3  ;;  %s1861_s12 = smov 96   ;;  %v1269_v21 = vld [vmem:[#allocation11] ss:$0 sm:$0xff]  ;;  %s1862_s14 = smov 32  }
  0xe8   : > { %1323 = vmatprep.subr.bf16.mxu1 %v1859_v0  ;;  %1325 = vmatprep.mubr.msk.bf16.mxu1 %vm1860_vm0, %v1859_v0  ;;  %v1267_v29 = vld [vmem:[#allocation8] ss:$0 sm:$0xff]  ;;  %v1268_v31 = vld [vmem:[#allocation9] ss:$0 sm:$0xff]  ;;  %v1270_v32 = vld [vmem:[#allocation12] ss:$0 sm:$0xff] }
  0xe9   : > { %1316 = vmatpush3.bf16.msra.mxu0 %v1515_v1  ;;  %s1863_s13 = smov 112   ;;  %s1864_s20 = smov 104   ;;  %vm553_vm2 = vcmask 64512   ;;  %vm618_vm3 = vcmask 1043456   ;;  %vm663_vm4 = vcmask 60416   ;;  %vm783_vm5 = vcmask 126016  }
  0xea   : > { %1317 = vmatprep.subr.bf16.mxu0 %v1859_v0  ;;  %s1865_s23 = smov 88   ;;  %s1866_s22 = smov 120   ;;  %vm902_vm6 = vcmask 191616   ;;  %vm1021_vm7 = vcmask 257216  }
  0xeb   : > { %s1867_s21 = smov 80   ;;  %s1868_s17 = smov 72  }
  0xec   : > { %s1869_s24 = smov 64   ;;  %s1870_s9 = smov 56  }
  0xed   : > { %1318 = vmatpush3.bf16.msra.mxu0 %v1516_v2  ;;  %s1871_s16 = smov 48   ;;  %p2375_p13 = scmp.ne.s32.totalorder %s2363_s26, 0 }
  0xee   : > { %1329 = vmatprep.subr.bf16.mxu0 %v1859_v0 }
  0xf0   : > { %1320 = vmatmul.mubr.msk.bf16.vlgmr.msra.gmra.mrb[0].mxu0 %vm432_vm1, %v415_v4 }
  0xf1   : > { %1331 = vmatprep.mubr.msk.bf16.mxu0 %vm1860_vm0, %v1859_v0 }
 0x1c3   : > { %v2231_v5 = vpop.f32.mrb[0].mxu0 }
 0x1c4   : > { %509 = vrot.lane.b32.xlu0 %v2231_v5, %s1861_s12  ;;  %v1321_v6 = vpop.f32.mrb[1].mxu0  ;;  %v478_v7 = vsel %vm432_vm1, %v2231_v5, 0.0 }
 0x1c5   : > { %479 = vadd.xlane.f32.xlu1 %v478_v7  ;;  %v473_v8 = vpop.f32.mrb[2].mxu0 }
 0x1c6   : > { %v1322_v9 = vpop.f32.mrb[3].mxu0 }
 0x236   : > { %v510_v10 = vpop.permute.xlu0 %509 }
 0x237   : > { %v512_v11 = vsel %vm432_vm1, %v510_v10, 0.0 }
 0x238   : > { %513 = vadd.xlane.f32.xlu0 %v512_v11 }
 0x252   : > { %v480_v12 = vpop.xlane.xlu1 %479 }
 0x253   : > { %v482_v13 = vmul.f32 0.03125, %v480_v12 }
 0x255   : > { %v483_v14 = vsub.f32 %v2231_v5, %v482_v13 }
 0x257   : > { %v484_v15 = vmul.f32 %v483_v14, %v483_v14 }
 0x259   : > { %v485_v16 = vsel %vm432_vm1, %v484_v15, 0.0 }
 0x25a   : > { %486 = vadd.xlane.f32.xlu0 %v485_v16 }
 0x270   : > { %534 = vrot.lane.b32.xlu0 %v1269_v21, %s1862_s14 }
 0x2c5   : > { %v514_v17 = vpop.xlane.xlu0 %513 }
 0x2c6   : > { %v515_v18 = vmul.f32 0.03125, %v514_v17 }
 0x2c8   : > { %v516_v19 = vsub.f32 %v2231_v5, %v515_v18 }
 0x2ca   : > { %v517_v20 = vmul.f32 %v516_v19, %v516_v19 }
 0x2cc   : > { %519 = vrot.lane.b32.xlu1 %v517_v20, %s1861_s12 }
 0x2e7   : > { %v487_v22 = vpop.xlane.xlu0 %486 }
 0x2e8   : > { %v488_v23 = vmul.f32 0.03125, %v487_v22 }
 0x2ea   : > { %v489_v24 = vadd.f32 1e-05, %v488_v23 }
 0x2eb   : > { %v535_v39 = vpop.permute.xlu0 %534 }
 0x2ec   : > { %1519 = vrsqrt.f32 %v489_v24 }
 0x2f6   : > { %v1520_v27 = vpop.eup %1519 }
 0x2f7   : > { %v491_v28 = vmul.f32 %v1520_v27, %v483_v14 }
 0x2f9   : > { %v498_v30 = vmul.f32 %v1267_v29, %v491_v28  ;;  %v549_v28 = vpack.c.bf16 %v2231_v5, %v2231_v5 }
 0x2fb   : > { %v505_v33 = vadd.f32 %v1268_v31, %v498_v30 }
 0x2fd   : > { %v547_v34 = vpack.c.bf16 %v505_v33, %v505_v33 }
 0x33e   : > { %v520_v25 = vpop.permute.xlu1 %519 }
 0x33f   : > { %v522_v26 = vsel %vm432_vm1, %v520_v25, 0.0 }
 0x340   : > { %523 = vadd.xlane.f32.xlu1 %v522_v26 }
 0x351   : > { %543 = vrot.lane.b32.xlu1 %v1270_v32, %s1862_s14  ;;  %s1873_s14 = smov 8  }
 0x355   : > { %785 = vrot.lane.b32.xlu1 %v547_v34, %s1863_s13  ;;  %s1874_s13 = smov 16  }
 0x359   : > { %904 = vrot.lane.b32.xlu1 %v547_v34, %s1864_s20  ;;  %s1875_s20 = smov 24  }
 0x3cd   : > { %v524_v35 = vpop.xlane.xlu1 %523 }
 0x3ce   : > { %v525_v36 = vmul.f32 0.03125, %v524_v35 }
 0x3d0   : > { %v526_v37 = vadd.f32 1e-05, %v525_v36 }
 0x3d1   : > { %v544_v42 = vpop.permute.xlu1 %543 }
 0x3d2   : > { %1521 = vrsqrt.f32 %v526_v37 }
 0x3d5   : > { %v786_v53 = vpop.permute.xlu1 %785 }
 0x3d9   : > { %v905_v55 = vpop.permute.xlu1 %904 }
 0x3dc   : > { %v1522_v38 = vpop.eup %1521 }
 0x3dd   : > { %v528_v40 = vmul.f32 %v1522_v38, %v516_v19 }
 0x3df   : > { %v537_v41 = vmul.f32 %v535_v39, %v528_v40 }
 0x3e1   : > { %v546_v43 = vadd.f32 %v544_v42, %v537_v41 }
 0x3e3   : > { %v548_v44 = vpack.c.bf16 %v546_v43, %v546_v43 }
 0x3e5   : > { %551 = vrot.lane.b32.xlu0 %v548_v44, %s1861_s12  ;;  %s1872_s12 = smov 40  }
 0x3e9   : > { %668 = vrot.lane.b32.xlu0 %v548_v44, %s1865_s23  ;;  %s1287_s23 = sshll.u32 %s1943_s11, 7  ;;  %s1092_s11 = scalar_lea.sflag [#allocation5], %s2194_s25 }
 0x3ed   : > { %666 = vrot.lane.b32.xlu0 %v547_v34, %s1866_s22  ;;  %s412_s22 = scalar_lea.vmem [#allocation17], %s1255_s19 }
 0x3f1   : > { %787 = vrot.lane.b32.xlu0 %v548_v44, %s1867_s21  ;;  %s1105_s21 = sshll.u32 %s412_s22, 4  ;;  %s2301_s21 = int_to_ptr.vmem [resolvable:$true] %s1105_s21 }
 0x3f2   : > { %s1765_s19 = scalar_lea.vmem %s2301_s21, 128 }
 0x3f3   : > { %p1766_p12 = scmp.ne.s32.totalorder %s2301_s21, %s1765_s19 }
 0x3f5   : > { %906 = vrot.lane.b32.xlu0 %v548_v44, %s1868_s17  ;;  %p1767_p1 = pnand %p1766_p12, %p2375_p13 }
 0x3f7   : > { %p1768_p3 = pneg %p1767_p1 }
 0x457   : > { %v552_v45 = vpop.permute.xlu0 %551 }
 0x458   : > { %v558_v46 = vsel %vm553_vm2, %v552_v45, 0 }
 0x459   : > { %1324 = vmatpush3.bf16.xpose.msra.mxu1 %v558_v46 }
 0x45a   : > { %1335 = vmatprep.subr.bf16.mxu1 %v1859_v0 }
 0x45b   : > { %v669_v47 = vpop.permute.xlu0 %668 }
 0x45c   : > { %v674_v49 = vsel %vm553_vm2, %v669_v47, 0 }
 0x45f   : > { %v667_v48 = vpop.permute.xlu0 %666 }
 0x460   : > { %1326 = vmatmul.mubr.msk.bf16.vlgmr.msra.gmra.mrb[0].mxu1 %vm553_vm2, %v547_v34 }
 0x461   : > { %1336 = vmatpush3.bf16.xpose.msra.mxu1 %v674_v49  ;;  %1337 = vmatprep.mubr.msk.bf16.mxu1 %vm1860_vm0, %v1859_v0 }
 0x462   : > { %1347 = vmatprep.subr.bf16.mxu1 %v1859_v0 }
 0x463   : > { %v788_v50 = vpop.permute.xlu0 %787 }
 0x464   : > { %v793_v51 = vsel %vm553_vm2, %v788_v50, 0 }
 0x467   : > { %v907_v52 = vpop.permute.xlu0 %906 }
 0x468   : > { %1338 = vmatmul.mubr.msk.bf16.vlgmr.msra.gmra.mrb[4].mxu1 %vm553_vm2, %v667_v48  ;;  %v912_v54 = vsel %vm553_vm2, %v907_v52, 0 }
 0x469   : > { %1348 = vmatpush3.bf16.xpose.msra.mxu1 %v793_v51  ;;  %1349 = vmatprep.mubr.msk.bf16.mxu1 %vm1860_vm0, %v1859_v0 }
 0x46a   : > { %1359 = vmatprep.subr.bf16.mxu1 %v1859_v0 }
 0x470   : > { %1350 = vmatmul.mubr.msk.bf16.vlgmr.msra.gmra.mrb[8].mxu1 %vm553_vm2, %v786_v53 }
 0x471   : > { %1360 = vmatpush3.bf16.xpose.msra.mxu1 %v912_v54  ;;  %1361 = vmatprep.mubr.msk.bf16.mxu1 %vm1860_vm0, %v1859_v0 }
 0x472   : > { %1371 = vmatprep.subr.bf16.mxu1 %v1859_v0 }
 0x478   : > { %1362 = vmatmul.mubr.msk.bf16.vlgmr.msra.gmra.mrb[12].mxu1 %vm553_vm2, %v905_v55 }
 0x479   : > { %1375 = vmatprep.mubr.msk.bf16.mxu1 %vm1860_vm0, %v1859_v0 }
 0x533   : > { %v594_v56 = vpop.f32.mrb[0].mxu1 }
 0x534   : > { %v1327_v57 = vpop.f32.mrb[1].mxu1  ;;  %v600_v58 = vsel %vm553_vm2, %v594_v56, -inf }
 0x535   : > { %601 = vmax.xlane.f32.xlu0 %v600_v58  ;;  %v597_v59 = vpop.f32.mrb[2].mxu1 }
 0x536   : > { %v1328_v60 = vpop.f32.mrb[3].mxu1 }
 0x53b   : > { %v710_v61 = vpop.f32.mrb[4].mxu1 }
 0x53c   : > { %v1339_v62 = vpop.f32.mrb[5].mxu1  ;;  %v716_v63 = vsel %vm553_vm2, %v710_v61, -inf }
 0x53d   : > { %717 = vmax.xlane.f32.xlu1 %v716_v63  ;;  %v713_v1 = vpop.f32.mrb[6].mxu1 }
 0x53e   : > { %v1340_v2 = vpop.f32.mrb[7].mxu1 }
 0x543   : > { %v829_v3 = vpop.f32.mrb[8].mxu1 }
 0x544   : > { %v1351_v4 = vpop.f32.mrb[9].mxu1  ;;  %v835_v6 = vsel %vm553_vm2, %v829_v3, -inf }
 0x545   : > { %836 = vmax.xlane.f32.xlu0 %v835_v6  ;;  %v832_v7 = vpop.f32.mrb[10].mxu1  ;;  %v1517_v6 = vld [vmem:[#allocation14] sm:$0xff]  }
 0x546   : > { %v1352_v8 = vpop.f32.mrb[11].mxu1  ;;  %1372 = vmatpush3.bf16.msra.mxu1 %v1517_v6 }
 0x547   : > { %v1518_v8 = vld [vmem:[#allocation14 + $0x8] sm:$0xff]   ;;  %1373 = vmatprep.subr.bf16.mxu1 %v1859_v0 }
 0x54a   : > { %1374 = vmatpush3.bf16.msra.mxu1 %v1518_v8 }
 0x54b   : > { %v948_v9 = vpop.f32.mrb[12].mxu1 }
 0x54c   : > { %v1363_v10 = vpop.f32.mrb[13].mxu1  ;;  %v954_v11 = vsel %vm553_vm2, %v948_v9, -inf }
 0x54d   : > { %955 = vmax.xlane.f32.xlu0 %v954_v11  ;;  %v951_v12 = vpop.f32.mrb[14].mxu1 }
 0x54e   : > { %v1364_v13 = vpop.f32.mrb[15].mxu1 }
 0x5c2   : > { %v602_v14 = vpop.xlane.xlu0 %601 }
 0x5c3   : > { %v603_v15 = vsub.f32 %v594_v56, %v602_v14 }
 0x5c5   : > { %v604_v16 = vmul.f32 1.442695, %v603_v15 }
 0x5c7   : > { %1523 = vpow2.f32 %v604_v16 }
 0x5ca   : > { %v718_v17 = vpop.xlane.xlu1 %717 }
 0x5cb   : > { %v719_v18 = vsub.f32 %v710_v61, %v718_v17 }
 0x5cd   : > { %v720_v19 = vmul.f32 1.442695, %v719_v18 }
 0x5cf   : > { %1525 = vpow2.f32 %v720_v19 }
 0x5d1   : > { %v1524_v20 = vpop.eup %1523 }
 0x5d2   : > { %v606_v21 = vsel %vm553_vm2, %v1524_v20, 0.0  ;;  %v837_v22 = vpop.xlane.xlu0 %836 }
 0x5d3   : > { %607 = vadd.xlane.f32.xlu1 %v606_v21  ;;  %v838_v31 = vsub.f32 %v829_v3, %v837_v22  ;;  %v1282_v21 = vld [vmem:[#allocation15] ss:$0 sm:$0xff] }
 0x5d5   : > { %v839_v32 = vmul.f32 1.442695, %v838_v31 }
 0x5d9   : > { %v1526_v23 = vpop.eup %1525 }
 0x5da   : > { %v956_v24 = vpop.xlane.xlu0 %955  ;;  %v722_v25 = vsel %vm553_vm2, %v1526_v23, 0.0 }
 0x5db   : > { %v957_v26 = vsub.f32 %v948_v9, %v956_v24  ;;  %723 = vadd.xlane.f32.xlu0 %v722_v25 }
 0x5dd   : > { %v958_v27 = vmul.f32 1.442695, %v957_v26 }
 0x5df   : > { %1527 = vpow2.f32 %v958_v27 }
 0x5e0   : > { %1529 = vpow2.f32 %v839_v32 }
 0x5e4   : > { %613 = vrot.lane.b32.xlu1 %v549_v28, %s1869_s24 }
 0x5e9   : > { %v1528_v29 = vpop.eup %1527 }
 0x5ea   : > { %v960_v30 = vsel %vm553_vm2, %v1528_v29, 0.0  ;;  %v1530_v33 = vpop.eup %1529 }
 0x5eb   : > { %961 = vadd.xlane.f32.xlu0 %v960_v30  ;;  %v841_v34 = vsel %vm553_vm2, %v1530_v33, 0.0 }
 0x601   : > { %728 = vrot.lane.b32.xlu0 %v549_v28, %s1870_s9  ;;  %s2299_s9 = scalar_lea.hbm %s2352_s8, %s1287_s23 }
 0x608   : > { %842 = vadd.xlane.f32.xlu1 %v841_v34 }
 0x619   : > { %847 = vrot.lane.b32.xlu1 %v549_v28, %s1871_s16  ;;  %s1876_s16 = smov [#allocation17]  }
 0x61d   : > { %966 = vrot.lane.b32.xlu1 %v549_v28, %s1872_s12  ;;  %s1769_s12 = sshll.u32 %s1876_s16, 4  ;;  %s1770_s12 = int_to_ptr.vmem [resolvable:$false] %s1769_s12 }
 0x61e   : > { %p1772_p2 = scmp.lt.s32.totalorder %s2301_s21, %s1770_s12 }
 0x660   : > { %v608_v5 = vpop.xlane.xlu1 %607 }
 0x661   : > { %1531 = vrcp.f32 %v608_v5 }
 0x664   : > { %v614_v35 = vpop.permute.xlu1 %613 }
 0x665   : > { %v620_v36 = vsel %vm618_vm3, %v614_v35, 0 }
 0x666   : > { %1330 = vmatpush3.bf16.msra.mxu0 %v620_v36 }
 0x667   : > { %1341 = vmatprep.subr.bf16.mxu0 %v1859_v0 }
 0x668   : > { %v724_v38 = vpop.xlane.xlu0 %723 }
 0x669   : > { %1533 = vrcp.f32 %v724_v38 }
 0x66b   : > { %v1532_v37 = vpop.eup %1531 }
 0x66c   : > { %v610_v39 = vmul.f32 %v1532_v37, %v1524_v20 }
 0x66e   : > { %v611_v40 = vpack.c.bf16 %v610_v39, %v610_v39 }
 0x670   : > { %1332 = vmatmul.mubr.msk.bf16.vlgmr.msra.gmra.mrb[4].mxu0 %vm553_vm2, %v611_v40 }
 0x671   : > { %1343 = vmatprep.mubr.msk.bf16.mxu0 %vm1860_vm0, %v1859_v0 }
 0x673   : > { %v1534_v41 = vpop.eup %1533 }
 0x674   : > { %v726_v43 = vmul.f32 %v1534_v41, %v1526_v23 }
 0x676   : > { %v727_v46 = vpack.c.bf16 %v726_v43, %v726_v43 }
 0x678   : > { %v962_v42 = vpop.xlane.xlu0 %961 }
 0x67c   : > { %v729_v44 = vpop.permute.xlu0 %728 }
 0x67d   : > { %v734_v45 = vsel %vm618_vm3, %v729_v44, 0 }
 0x67e   : > { %1342 = vmatpush3.bf16.msra.mxu0 %v734_v45 }
 0x67f   : > { %1353 = vmatprep.subr.bf16.mxu0 %v1859_v0 }
 0x681   : > { %1344 = vmatmul.mubr.msk.bf16.vlgmr.msra.gmra.mrb[8].mxu0 %vm553_vm2, %v727_v46 }
 0x682   : > { %1355 = vmatprep.mubr.msk.bf16.mxu0 %vm1860_vm0, %v1859_v0 }
 0x695   : > { %v843_v47 = vpop.xlane.xlu1 %842 }
 0x696   : > { %1535 = vrcp.f32 %v843_v47 }
 0x697   : > { %1537 = vrcp.f32 %v962_v42 }
 0x699   : > { %v848_v48 = vpop.permute.xlu1 %847 }
 0x69a   : > { %v853_v49 = vsel %vm618_vm3, %v848_v48, 0 }
 0x69b   : > { %1354 = vmatpush3.bf16.msra.mxu0 %v853_v49 }
 0x69c   : > { %1365 = vmatprep.subr.bf16.mxu0 %v1859_v0 }
 0x69d   : > { %v967_v52 = vpop.permute.xlu1 %966 }
 0x69e   : > { %v972_v55 = vsel %vm618_vm3, %v967_v52, 0 }
 0x6a0   : > { %v1536_v50 = vpop.eup %1535 }
 0x6a1   : > { %v845_v51 = vmul.f32 %v1536_v50, %v1530_v33  ;;  %v1538_v54 = vpop.eup %1537 }
 0x6a2   : > { %v964_v56 = vmul.f32 %v1538_v54, %v1528_v29 }
 0x6a3   : > { %v846_v53 = vpack.c.bf16 %v845_v51, %v845_v51 }
 0x6a4   : > { %v965_v57 = vpack.c.bf16 %v964_v56, %v964_v56 }
 0x6a5   : > { %1356 = vmatmul.mubr.msk.bf16.vlgmr.msra.gmra.mrb[12].mxu0 %vm553_vm2, %v846_v53 }
 0x6a6   : > { %1366 = vmatpush3.bf16.msra.mxu0 %v972_v55  ;;  %1367 = vmatprep.mubr.msk.bf16.mxu0 %vm1860_vm0, %v1859_v0 }
 0x6ad   : > { %1368 = vmatmul.mubr.msk.bf16.vlgmr.msra.gmra.mrb[16].mxu0 %vm553_vm2, %v965_v57 }
 0x743   : > { %v656_v58 = vpop.f32.mrb[4].mxu0 }
 0x744   : > { %v662_v59 = vpack.c.bf16 %v656_v58, %v656_v58  ;;  %v1333_v60 = vpop.f32.mrb[5].mxu0 }
 0x745   : > { %v659_v61 = vpop.f32.mrb[6].mxu0 }
 0x746   : > { %664 = vst.msk [vmem:[#allocation2] sm:$0xf] %vm663_vm4, %v662_v59  ;;  %v1334_v62 = vpop.f32.mrb[7].mxu0 }
 0x754   : > { %v770_v63 = vpop.f32.mrb[8].mxu0 }
 0x755   : > { %v1290_v1 = vpack.c.bf16 %v770_v63, %v770_v63  ;;  %v1345_v2 = vpop.f32.mrb[9].mxu0 }
 0x756   : > { %v773_v3 = vpop.f32.mrb[10].mxu0 }
 0x757   : > { %780 = vrot.lane.b32.xlu0 %v1290_v1, %s1873_s14  ;;  %v1346_v4 = vpop.f32.mrb[11].mxu0  ;;  %s1771_s14 = scalar_lea.vmem %s1770_s12, 256 }
 0x758   : > { %p1773_p0 = scmp.lt.s32.totalorder %s1771_s14, %s1765_s19 }
 0x75a   : > { %p1774_p6 = por %p1773_p0, %p1772_p2 }
 0x75c   : > { %p1775_p10 = pnand %p1774_p6, %p1768_p3 }
 0x778   : > { %v889_v7 = vpop.f32.mrb[12].mxu0 }
 0x779   : > { %v1291_v9 = vpack.c.bf16 %v889_v7, %v889_v7  ;;  %v1357_v10 = vpop.f32.mrb[13].mxu0 }
 0x77a   : > { %v892_v11 = vpop.f32.mrb[14].mxu0 }
 0x77b   : > { %899 = vrot.lane.b32.xlu1 %v1291_v9, %s1874_s13  ;;  %v1358_v12 = vpop.f32.mrb[15].mxu0 }
 0x780   : > { %v1008_v13 = vpop.f32.mrb[16].mxu0 }
 0x781   : > { %v1292_v14 = vpack.c.bf16 %v1008_v13, %v1008_v13  ;;  %v1369_v15 = vpop.f32.mrb[17].mxu0 }
 0x782   : > { %v1011_v16 = vpop.f32.mrb[18].mxu0 }
 0x783   : > { %1018 = vrot.lane.b32.xlu0 %v1292_v14, %s1875_s20  ;;  %v1370_v17 = vpop.f32.mrb[19].mxu0 }
 0x7c9   : > { %v781_v18 = vpop.permute.xlu0 %780 }
 0x7ca   : > { %784 = vst.msk [vmem:[#allocation2] sm:$0xf] %vm783_vm5, %v781_v18 }
 0x7ed   : > { %v900_v19 = vpop.permute.xlu1 %899 }
 0x7ee   : > { %903 = vst.msk [vmem:[#allocation2] sm:$0xf] %vm902_vm6, %v900_v19 }
 0x7f5   : > { %v1019_v0 = vpop.permute.xlu0 %1018 }
 0x7f6   : > { %1022 = vst.msk [vmem:[#allocation2] sm:$0xf] %vm1021_vm7, %v1019_v0 }
 0x7fd   : > { %v1023_v20 = vld [vmem:[#allocation2] sm:$0xf] }
 0x7fe   : > { %1376 = vmatmul.mubr.msk.bf16.vlgmr.msra.gmra.mrb[16].mxu1 %vm432_vm1, %v1023_v20 }
 0x8d1   : > { %v1084_v22 = vpop.f32.mrb[16].mxu1 }
 0x8d2   : > { %v1085_v23 = vadd.f32 %v1282_v21, %v1084_v22  ;;  %v1377_v24 = vpop.f32.mrb[17].mxu1 }
 0x8d3   : > { %v1087_v25 = vpop.f32.mrb[18].mxu1 }
 0x8d4   : > { %v1378_v26 = vpop.f32.mrb[19].mxu1  ;;  %1090 = vst.msk [vmem:[%s412_s22] sm:$0xff] %vm432_vm1, %v1085_v23 }
 0x8d5   : > { %1778 = shalt.err (!%p1775_p10)
}
 0x8d6   : > { %s1779_s25 = scalar_lea.hbm %s2299_s9, 128  ;;  %s1783_s23 = scalar_lea.hbm %s2352_s8, 256 }
 0x8d7   : > { %p1780_p11 = scmp.ne.s32.totalorder %s2299_s9, %s1779_s25  ;;  %p1784_p9 = scmp.lt.u32.totalorder %s2299_s9, %s2352_s8 }
 0x8d8   : > { %p1785_p7 = scmp.lt.u32.totalorder %s1783_s23, %s1779_s25  ;;  %p1787_p12 = scmp.lt.u32.totalorder %s1779_s25, %s2299_s9 }
 0x8d9   : > { %p1781_p8 = pnand %p1780_p11, %p2375_p13 }
 0x8da   : > { %p1786_p4 = por %p1785_p7, %p1784_p9 }
 0x8db   : > { %p1782_p5 = pneg %p1781_p8 }
 0x8dc   : > { %p1788_p1 = por %p1787_p12, %p1786_p4 }
 0x8de   : > { %p1789_p3 = pnand %p1788_p1, %p1782_p5 }
 0x8e0   : > { %1792 = shalt.err (!%p1789_p3)
}
 0x8e1   : > { %1409 = dma.vmem_to_hbm [thread:$0]  (%p2375_p13), %s2301_s21, 128, %s2299_s9, %s1092_s11  }
 0x8e2 PF: > { %s1117_s24 = sand.u32 1, %s1835_s27   ;;  %p2376_p2 = scmp.ne.s32.totalorder %s2364_s18, 0 }
 0x8e3   : > { %p2377_p0 = scmp.ge.s32.totalorder %s1847_s30, 2  ;;  %s1118_s19 = scalar_lea.sflag [#allocation5], %s1117_s24 }
 0x8e5   : > { %p1438_p6 = pnand %p2377_p0, %p2376_p2 }
 0x8e7   : > { %1830 = dma.done.wait (!%p1438_p6), %s1118_s19, 128  }
 0x8e8   : > { %1832 = vsyncadd (!%p1438_p6), %s1118_s19, 4294967168  ;;  %p25_p10 = scmp.ge.s32.totalorder %s2124_s15, 4   ;;  %s2378_s27 = smov %s1839_s28 }
 0x8e9   : > { %s2379_s28 = smov %s1843_s29  ;;  %s2380_s29 = smov %s2136_s10 }
 0x8ea   : > { %s2381_s30 = smov %s2124_s15  ;;  %27 = sbr.rel (!%p25_p10) target bundleno = 9 (0x9), region = 125 }
 0x8f1   :  { %1123 = vsyncpa [#allocation4], 1 }
 0x8f2   :  { %1125 = vsyncpa [#allocation4 + $0x1], 1 }
 0x8f3   :  { %1126 = vsyncpa [#allocation7], 1 }
 0x8f4   :  { %1127 = vsyncpa [#allocation10], 1 }
 0x8f5   :  { %1128 = vsyncpa [#allocation13], 1 }
 0x8f6   :  { %1129 = vsyncpa [#allocation16], 1 }
 0x8f7   :  { %1130 = vsyncpa [#allocation5], 1 }
 0x8f8   :  { %1132 = vsyncpa [#allocation5 + $0x1], 1 }

// kernel: tpu_custom_call.1
= control target key start
LH: loop header
LB: loop body
LE: loop exit
PB: predicated region body
PF: predicated region fallthrough
CT: control target
= control target key end

     0   :  { %13 = vsyncpa [#allocation4], 0  ;;  %s2344_s0 = inlined_call_operand.hbm [shape: f32[2,8,32], index: 0, kind: input, shape index: {}]   ;;  %s2345_s1 = inlined_call_operand.hbm [shape: bf16[32,96], index: 1, kind: input, shape index: {}]   ;;  %s2346_s2 = inlined_call_operand.hbm [shape: f32[1,32], index: 2, kind: input, shape index: {}]   ;;  %s2347_s3 = inlined_call_operand.hbm [shape: f32[1,32], index: 3, kind: input, shape index: {}]   ;;  %s2348_s4 = inlined_call_operand.hbm [shape: f32[1,32], index: 4, kind: input, shape index: {}]   ;;  %s2349_s5 = inlined_call_operand.hbm [shape: f32[1,32], index: 5, kind: input, shape index: {}]   ;;  %s2350_s6 = inlined_call_operand.hbm [shape: bf16[32,32], index: 6, kind: input, shape index: {}]   ;;  %s2351_s7 = inlined_call_operand.hbm [shape: f32[1,32], index: 7, kind: input, shape index: {}]   ;;  %s2352_s8 = inlined_call_operand.hbm [shape: f32[2,8,32], index: 8, kind: output, shape index: {}]  }
   0x1   :  { %15 = vsyncpa [#allocation4 + $0x1], 0 }
   0x2   :  { %16 = vsyncpa [#allocation7], 0 }
   0x3   :  { %17 = vsyncpa [#allocation10], 0 }
   0x4   :  { %18 = vsyncpa [#allocation13], 0 }
   0x5   :  { %19 = vsyncpa [#allocation16], 0 }
   0x6   :  { %20 = vsyncpa [#allocation5], 0 }
   0x7   :  { %22 = vsyncpa [#allocation5 + $0x1], 0  ;;  %s1922_s27 = smov 0   ;;  %s1924_s28 = smov 0  }
   0x8   :  { %s1926_s29 = smov 0   ;;  %s1928_s30 = smov 0  }
   0x9 LB: > { %s1849_s9 = smov [#allocation6]   ;;  %s1943_s11 = sadd.s32 4294967295, %s1847_s30   ;;  %s1847_s30 = sphi %s1928_s30, %s2381_s30   ;;  %s1843_s29 = sphi %s1926_s29, %s2380_s29   ;;  %s1839_s28 = sphi %s1924_s28, %s2379_s28   ;;  %s1835_s27 = sphi %s1922_s27, %s2378_s27  }
   0xa   : > { %s244_s10 = sshll.u32 %s1849_s9, 4  ;;  %p1243_p0 = scmp.ge.s32.totalorder %s1847_s30, 1  ;;  %s1948_s10 = int_to_ptr.vmem [resolvable:$true] %s244_s10 }
   0xb   : > { %p2354_p1 = scmp.eq.s32.totalorder %s1943_s11, 0  ;;  %p232_p2 = scmp.lt.s32.totalorder %s1847_s30, 3 }
   0xc   : > { %s1850_s13 = smov [#allocation9]   ;;  %s1851_s16 = smov [#allocation12]  }
   0xd   : > { %p1950_p3 = pnand %p1243_p0, %p232_p2  ;;  %s269_s14 = sshll.u32 %s1850_s13, 4  ;;  %s1963_s14 = int_to_ptr.vmem [resolvable:$true] %s269_s14 }
   0xe   : > { %s291_s17 = sshll.u32 %s1851_s16, 4  ;;  %s1539_s20 = scalar_lea.hbm %s2345_s1, 256  ;;  %s1965_s17 = int_to_ptr.vmem [resolvable:$true] %s291_s17 }
   0xf   : > { %s2357_s12 = scalar_select %p1950_p3, 1, 0 }
  0x10   : > { %p1411_p5 = pneg %p1950_p3  ;;  %p1540_p7 = scmp.ne.s32.totalorder %s2345_s1, %s1539_s20 }
  0x11   : > { %p1546_p11 = scmp.lt.u32.totalorder %s1539_s20, %s2345_s1 }
  0x12   : > { %p1959_p6 = pnand %p1411_p5, %p2354_p1 }
  0x14   : > { %p1975_p8 = pneg %p1959_p6 }
  0x16   : > { %p1542_p9 = pnand %p1975_p8, %p1540_p7 }
  0x18   : > { %p1543_p10 = pneg %p1542_p9 }
  0x1a   : > { %p1548_p12 = pnand %p1546_p11, %p1543_p10 }
  0x1c   : > { %1551 = shalt.err (!%p1548_p12)
}
  0x1d   : > { %s1552_s26 = scalar_lea.vmem %s1948_s10, 256  ;;  %p1560_p5 = scmp.lt.s32.totalorder %s1948_s10, %s1948_s10 }
  0x1e   : > { %p1553_p13 = scmp.ne.s32.totalorder %s1948_s10, %s1552_s26  ;;  %p1561_p4 = scmp.lt.s32.totalorder %s1552_s26, %s1552_s26 }
  0x20   : > { %p1555_p0 = pnand %p1553_p13, %p1975_p8  ;;  %p1562_p7 = por %p1561_p4, %p1560_p5 }
  0x22   : > { %p1556_p2 = pneg %p1555_p0 }
  0x24   : > { %p1563_p9 = pnand %p1562_p7, %p1556_p2 }
  0x26   : > { %1566 = shalt.err (!%p1563_p9)
}
  0x27   : > { %s2353_s9 = smov 64   ;;  %s1853_s13 = smov 4  }
  0x28   : > { %1414 = dma.hbm_to_vmem [thread:$0]  (!%p1959_p6), %s2345_s1, 256, %s1948_s10, [#allocation7], %s2353_s9, %s2353_s9, %s1853_s13  }
  0x29   : > { %s1567_s21 = scalar_lea.hbm %s2347_s3, 16 }
  0x2a   : > { %p1568_p4 = scmp.ne.s32.totalorder %s2347_s3, %s1567_s21  ;;  %p1574_p12 = scmp.lt.u32.totalorder %s1567_s21, %s2347_s3 }
  0x2c   : > { %p1570_p10 = pnand %p1568_p4, %p1975_p8 }
  0x2e   : > { %p1571_p11 = pneg %p1570_p10 }
  0x30   : > { %p1576_p13 = pnand %p1574_p12, %p1571_p11 }
  0x32   : > { %1579 = shalt.err (!%p1576_p13)
}
  0x33   : > { %s1580_s10 = scalar_lea.vmem %s1963_s14, 16  ;;  %s1587_s16 = scalar_lea.vmem %s1963_s14, 32 }
  0x34   : > { %p1581_p0 = scmp.ne.s32.totalorder %s1963_s14, %s1580_s10  ;;  %p1588_p7 = scmp.lt.s32.totalorder %s1963_s14, %s1963_s14 }
  0x35   : > { %p1589_p9 = scmp.lt.s32.totalorder %s1587_s16, %s1580_s10 }
  0x36   : > { %p1583_p2 = pnand %p1581_p0, %p1975_p8 }
  0x37   : > { %p1590_p4 = por %p1589_p9, %p1588_p7 }
  0x38   : > { %p1584_p5 = pneg %p1583_p2 }
  0x3a   : > { %p1591_p10 = pnand %p1590_p4, %p1584_p5 }
  0x3c   : > { %1594 = shalt.err (!%p1591_p10)
}
  0x3d   : > { %1420 = dma.hbm_to_vmem [thread:$0]  (!%p1959_p6), %s2347_s3, 16, %s1963_s14, [#allocation10]  }
  0x3e   : > { %s1595_s22 = scalar_lea.hbm %s2349_s5, 16 }
  0x3f   : > { %p1596_p11 = scmp.ne.s32.totalorder %s2349_s5, %s1595_s22  ;;  %p1602_p0 = scmp.lt.u32.totalorder %s1595_s22, %s2349_s5 }
  0x41   : > { %p1598_p12 = pnand %p1596_p11, %p1975_p8 }
  0x43   : > { %p1599_p13 = pneg %p1598_p12 }
  0x45   : > { %p1604_p2 = pnand %p1602_p0, %p1599_p13 }
  0x47   : > { %1607 = shalt.err (!%p1604_p2)
}
  0x48   : > { %s1608_s14 = scalar_lea.vmem %s1965_s17, 16  ;;  %s1615_s16 = scalar_lea.vmem %s1965_s17, 32 }
  0x49   : > { %p1609_p5 = scmp.ne.s32.totalorder %s1965_s17, %s1608_s14  ;;  %p1616_p4 = scmp.lt.s32.totalorder %s1965_s17, %s1965_s17 }
  0x4a   : > { %p1617_p10 = scmp.lt.s32.totalorder %s1615_s16, %s1608_s14 }
  0x4b   : > { %p1611_p7 = pnand %p1609_p5, %p1975_p8 }
  0x4c   : > { %p1618_p11 = por %p1617_p10, %p1616_p4 }
  0x4d   : > { %p1612_p9 = pneg %p1611_p7 }
  0x4f   : > { %p1619_p12 = pnand %p1618_p11, %p1612_p9 }
  0x51   : > { %1622 = shalt.err (!%p1619_p12)
}
  0x52   : > { %1426 = dma.hbm_to_vmem [thread:$0]  (!%p1959_p6), %s2349_s5, 16, %s1965_s17, [#allocation13]  }
  0x53   : > { %s1854_s20 = smov [#allocation8]   ;;  %s1855_s22 = smov [#allocation11]  }
  0x54   : > { %s258_s21 = sshll.u32 %s1854_s20, 4  ;;  %s280_s24 = sshll.u32 %s1855_s22, 4  ;;  %s259_s21 = int_to_ptr.vmem [resolvable:$true] %s258_s21  ;;  %s281_s24 = int_to_ptr.vmem [resolvable:$true] %s280_s24 }
  0x55   : > { %s1623_s10 = scalar_lea.hbm %s2346_s2, 16 }
  0x56   : > { %p1624_p13 = scmp.ne.s32.totalorder %s2346_s2, %s1623_s10  ;;  %p1630_p5 = scmp.lt.u32.totalorder %s1623_s10, %s2346_s2 }
  0x58   : > { %p1626_p0 = pnand %p1624_p13, %p1975_p8 }
  0x5a   : > { %p1627_p2 = pneg %p1626_p0 }
  0x5c   : > { %p1632_p7 = pnand %p1630_p5, %p1627_p2 }
  0x5e   : > { %1635 = shalt.err (!%p1632_p7)
}
  0x5f   : > { %s1636_s17 = scalar_lea.vmem %s259_s21, 16  ;;  %s1643_s19 = scalar_lea.vmem %s259_s21, 32 }
  0x60   : > { %p1637_p9 = scmp.ne.s32.totalorder %s259_s21, %s1636_s17  ;;  %p1644_p11 = scmp.lt.s32.totalorder %s259_s21, %s259_s21 }
  0x61   : > { %p1645_p12 = scmp.lt.s32.totalorder %s1643_s19, %s1636_s17 }
  0x62   : > { %p1639_p4 = pnand %p1637_p9, %p1975_p8 }
  0x63   : > { %p1646_p1 = por %p1645_p12, %p1644_p11 }
  0x64   : > { %p1640_p10 = pneg %p1639_p4 }
  0x66   : > { %p1647_p3 = pnand %p1646_p1, %p1640_p10 }
  0x68   : > { %1650 = shalt.err (!%p1647_p3)
}
  0x69   : > { %1417 = dma.hbm_to_vmem [thread:$0]  (!%p1959_p6), %s2346_s2, 16, %s259_s21, [#allocation7]  }
  0x6a   : > { %s1651_s26 = scalar_lea.hbm %s2348_s4, 16 }
  0x6b   : > { %p1652_p13 = scmp.ne.s32.totalorder %s2348_s4, %s1651_s26  ;;  %p1658_p3 = scmp.lt.u32.totalorder %s1651_s26, %s2348_s4 }
  0x6d   : > { %p1654_p0 = pnand %p1652_p13, %p1975_p8 }
  0x6f   : > { %p1655_p1 = pneg %p1654_p0 }
  0x71   : > { %p1660_p2 = pnand %p1658_p3, %p1655_p1 }
  0x73   : > { %1663 = shalt.err (!%p1660_p2)
}
  0x74   : > { %s1664_s17 = scalar_lea.vmem %s281_s24, 16  ;;  %s1671_s21 = scalar_lea.vmem %s281_s24, 32 }
  0x75   : > { %p1665_p5 = scmp.ne.s32.totalorder %s281_s24, %s1664_s17  ;;  %p1672_p4 = scmp.lt.s32.totalorder %s281_s24, %s281_s24 }
  0x76   : > { %p1673_p10 = scmp.lt.s32.totalorder %s1671_s21, %s1664_s17 }
  0x77   : > { %p1667_p7 = pnand %p1665_p5, %p1975_p8 }
  0x78   : > { %p1674_p11 = por %p1673_p10, %p1672_p4 }
  0x79   : > { %p1668_p9 = pneg %p1667_p7 }
  0x7b   : > { %p1675_p12 = pnand %p1674_p11, %p1668_p9 }
  0x7d   : > { %1678 = shalt.err (!%p1675_p12)
}
  0x7e   : > { %1423 = dma.hbm_to_vmem [thread:$0]  (!%p1959_p6), %s2348_s4, 16, %s281_s24, [#allocation10]  }
  0x7f   : > { %s1856_s22 = smov [#allocation14]   ;;  %s1857_s25 = smov [#allocation15]  }
  0x80   : > { %s301_s9 = sshll.u32 %s1856_s22, 4  ;;  %s315_s26 = sshll.u32 %s1857_s25, 4  ;;  %s302_s9 = int_to_ptr.vmem [resolvable:$true] %s301_s9  ;;  %s316_s26 = int_to_ptr.vmem [resolvable:$true] %s315_s26 }
  0x81   : > { %s1679_s16 = scalar_lea.hbm %s2350_s6, 256 }
  0x82   : > { %p1680_p13 = scmp.ne.s32.totalorder %s2350_s6, %s1679_s16  ;;  %p1686_p3 = scmp.lt.u32.totalorder %s1679_s16, %s2350_s6 }
  0x84   : > { %p1682_p0 = pnand %p1680_p13, %p1975_p8 }
  0x86   : > { %p1683_p1 = pneg %p1682_p0 }
  0x88   : > { %p1688_p2 = pnand %p1686_p3, %p1683_p1 }
  0x8a   : > { %1691 = shalt.err (!%p1688_p2)
}
  0x8b   : > { %s1692_s24 = scalar_lea.vmem %s302_s9, 256  ;;  %p1700_p4 = scmp.lt.s32.totalorder %s302_s9, %s302_s9 }
  0x8c   : > { %p1693_p5 = scmp.ne.s32.totalorder %s302_s9, %s1692_s24  ;;  %p1701_p10 = scmp.lt.s32.totalorder %s1692_s24, %s1692_s24 }
  0x8e   : > { %p1695_p7 = pnand %p1693_p5, %p1975_p8  ;;  %p1702_p11 = por %p1701_p10, %p1700_p4 }
  0x90   : > { %p1696_p9 = pneg %p1695_p7 }
  0x92   : > { %p1703_p12 = pnand %p1702_p11, %p1696_p9 }
  0x94   : > { %1706 = shalt.err (!%p1703_p12)
}
  0x95   : > { %s2360_s20 = smov 64   ;;  %s1707_s16 = scalar_lea.hbm %s2351_s7, 16 }
  0x96   : > { %1429 = dma.hbm_to_vmem [thread:$0]  (!%p1959_p6), %s2350_s6, 256, %s302_s9, [#allocation13], %s2360_s20, %s2360_s20, %s1853_s13  }
  0x97   : > { %p1708_p13 = scmp.ne.s32.totalorder %s2351_s7, %s1707_s16  ;;  %p1714_p3 = scmp.lt.u32.totalorder %s1707_s16, %s2351_s7 }
  0x99   : > { %p1710_p0 = pnand %p1708_p13, %p1975_p8 }
  0x9b   : > { %p1711_p1 = pneg %p1710_p0 }
  0x9d   : > { %p1716_p2 = pnand %p1714_p3, %p1711_p1 }
  0x9f   : > { %1719 = shalt.err (!%p1716_p2)
}
  0xa0   : > { %s1720_s24 = scalar_lea.vmem %s316_s26, 16  ;;  %s1727_s13 = scalar_lea.vmem %s316_s26, 32 }
  0xa1   : > { %p1721_p5 = scmp.ne.s32.totalorder %s316_s26, %s1720_s24  ;;  %p1728_p4 = scmp.lt.s32.totalorder %s316_s26, %s316_s26 }
  0xa2   : > { %p1729_p10 = scmp.lt.s32.totalorder %s1727_s13, %s1720_s24 }
  0xa3   : > { %p1723_p7 = pnand %p1721_p5, %p1975_p8 }
  0xa4   : > { %p1730_p11 = por %p1729_p10, %p1728_p4 }
  0xa5   : > { %p1724_p9 = pneg %p1723_p7 }
  0xa7   : > { %p1731_p12 = pnand %p1730_p11, %p1724_p9 }
  0xa9   : > { %1734 = shalt.err (!%p1731_p12)
}
  0xaa   : > { %1432 = dma.hbm_to_vmem [thread:$0]  (!%p1959_p6), %s2351_s7, 16, %s316_s26, [#allocation16]  }
  0xab   : > { %s1242_s23 = sadd.s32 4294967294, %s1847_s30   ;;  %s2124_s15 = sadd.s32 1, %s1847_s30  }
  0xac   : > { %s35_s22 = sadd.s32 1, %s1843_s29  ;;  %s32_s25 = ssub.s32 %s1847_s30, %s2124_s15 }
  0xad   : > { %p42_p8 = scmp.ne.s32.totalorder %s1843_s29, %s1839_s28  ;;  %p33_p13 = scmp.eq.s32.totalorder %s32_s25, 0 }
  0xae   : > { %p43_p0 = scmp.eq.s32.totalorder %s1847_s30, 0  ;;  %p48_p1 = scmp.ne.s32.totalorder %s1839_s28, %s1835_s27 }
  0xaf   : > { %p219_p3 = scmp.eq.s32.totalorder %s1943_s11, 1  ;;  %p2361_p5 = scmp.eq.s32.totalorder %s1943_s11, 0 }
  0xb0   : > { %s2136_s10 = scalar_select %p33_p13, %s1843_s29, %s35_s22  }
  0xb1   : > { %p44_p2 = por %p43_p0, %p42_p8  ;;  %p2140_p7 = por %p2361_p5, %p48_p1 }
  0xb2   : > { %p2144_p6 = por %p219_p3, %p42_p8  ;;  %p225_p9 = scmp.eq.s32.totalorder %s1242_s23, 1 }
  0xb3   : > { %p1448_p4 = scmp.lt.s32.totalorder %s1847_s30, 2  ;;  %s326_s16 = sand.u32 1, %s1843_s29  }
  0xb4   : > { %s2363_s26 = scalar_select %p2144_p6, 1, 0 }
  0xb5   : > { %p2150_p10 = por %p225_p9, %p48_p1  ;;  %s1252_s17 = sshll.u32 %s326_s16, 3 }
  0xb6   : > { %s1253_s21 = sshll.u32 %s1847_s30, 7  ;;  %s330_s9 = scalar_lea.vmem [#allocation3], %s1252_s17 }
  0xb7   : > { %s2364_s18 = scalar_select %p2150_p10, 1, 0 }
  0xb8   : > { %s2158_s13 = scalar_lea.hbm %s2344_s0, %s1253_s21  ;;  %s337_s20 = sshll.u32 %s330_s9, 4  ;;  %s2164_s20 = int_to_ptr.vmem [resolvable:$true] %s337_s20 }
  0xb9   : > { %p2160_p11 = pnand %p1448_p4, %p44_p2  ;;  %s327_s22 = scalar_lea.sflag [#allocation4], %s326_s16 }
  0xba   : > { %s1735_s25 = scalar_lea.hbm %s2158_s13, 128  ;;  %s1740_s19 = scalar_lea.hbm %s2344_s0, 256 }
  0xbb   : > { %p1736_p12 = scmp.ne.s32.totalorder %s2158_s13, %s1735_s25  ;;  %p1737_p8 = pneg %p2160_p11 }
  0xbc   : > { %p1741_p1 = scmp.lt.u32.totalorder %s2158_s13, %s2344_s0  ;;  %p1742_p3 = scmp.lt.u32.totalorder %s1740_s19, %s1735_s25 }
  0xbd   : > { %p1738_p13 = pnand %p1737_p8, %p1736_p12  ;;  %p1744_p5 = scmp.lt.u32.totalorder %s1735_s25, %s2158_s13 }
  0xbe   : > { %p1743_p2 = por %p1742_p3, %p1741_p1 }
  0xbf   : > { %p1739_p0 = pneg %p1738_p13 }
  0xc0   : > { %p1745_p9 = por %p1744_p5, %p1743_p2 }
  0xc2   : > { %p1746_p4 = pnand %p1745_p9, %p1739_p0 }
  0xc4   : > { %1749 = shalt.err (!%p1746_p4)
}
  0xc5   : > { %s1750_s16 = scalar_lea.vmem %s2164_s20, 128  ;;  %s1858_s21 = smov [#allocation3]  }
  0xc6   : > { %p1751_p12 = scmp.ne.s32.totalorder %s2164_s20, %s1750_s16  ;;  %s1755_s17 = sshll.u32 %s1858_s21, 4  ;;  %s1756_s17 = int_to_ptr.vmem [resolvable:$false] %s1755_s17 }
  0xc7   : > { %s1757_s24 = scalar_lea.vmem %s1756_s17, 256  ;;  %p1758_p6 = scmp.lt.s32.totalorder %s2164_s20, %s1756_s17 }
  0xc8   : > { %p1753_p13 = pnand %p1751_p12, %p1737_p8  ;;  %p1759_p1 = scmp.lt.s32.totalorder %s1757_s24, %s1750_s16 }
  0xca   : > { %p1754_p10 = pneg %p1753_p13  ;;  %p1760_p3 = por %p1759_p1, %p1758_p6 }
  0xcc   : > { %p1761_p2 = pnand %p1760_p3, %p1754_p10 }
  0xce   : > { %1764 = shalt.err (!%p1761_p2)
}
  0xcf   : > { %1436 = dma.hbm_to_vmem [thread:$0]  (!%p2160_p11), %s2158_s13, 128, %s2164_s20, %s327_s22  }
  0xd0   : > { %p2366_p0 = scmp.ne.s32.totalorder %s2357_s12, 0 }
  0xd1   : > { %s2194_s25 = sand.u32 (!%p2366_p0), 1, %s1839_s28  }
  0xd2   : > { %346 = sbr.rel (%p2366_p0) target bundleno = 2274 (0x8e2), region = 52  ;;  %s1255_s19 = sshll.u32 (!%p2366_p0), %s2194_s25, 3 }
  0xd3   : > { %s349_s9 = scalar_lea.sflag (!%p2366_p0), [#allocation4], %s2194_s25  ;;  %s352_s16 = scalar_lea.vmem (!%p2366_p0), [#allocation3], %s1255_s19 }
  0xd9   : > { %1810 = dma.done.wait (%p2140_p7), %s349_s9, 128  }
  0xda   : > { %1812 = vsyncadd (%p2140_p7), %s349_s9, 4294967168  ;;  %p2367_p6 = scmp.eq.s32.totalorder %s1943_s11, 0 }
  0xdc   : > { %1814 = dma.done.wait (%p2367_p6), [#allocation7], 272   ;;  %p2368_p10 = pmov %p2367_p6 }
  0xdd   : > { %p2369_p11 = pmov %p2367_p6 }
  0xde   : > { %1816 = vsyncadd (%p2368_p10), [#allocation7], 4294967024 }
  0xdf   : > { %1818 = dma.done.wait (%p2369_p11), [#allocation10], 32   ;;  %p2370_p8 = pmov %p2367_p6 }
  0xe0   : > { %p2371_p5 = pmov %p2367_p6 }
  0xe1   : > { %1820 = vsyncadd (%p2370_p8), [#allocation10], 4294967264 }
  0xe2   : > { %1822 = dma.done.wait (%p2371_p5), [#allocation13], 272   ;;  %p2372_p9 = pmov %p2371_p5 }
  0xe3   : > { %p2373_p7 = pmov %p2371_p5 }
  0xe4   : > { %1824 = vsyncadd (%p2372_p9), [#allocation13], 4294967024 }
  0xe5   : > { %1826 = dma.done.wait (%p2373_p7), [#allocation16], 16   ;;  %p2374_p4 = pmov %p2371_p5 }
  0xe6   : > { %v1859_v0 = vmov 0.0   ;;  %vm1860_vm0 = vmmov 0   ;;  %v1515_v1 = vld [vmem:[#allocation6] sm:$0xff]   ;;  %v1516_v2 = vld [vmem:[#allocation6 + $0x8] sm:$0xff]   ;;  %v414_v3 = vld [vmem:[%s352_s16] sm:$0xff]  ;;  %vm432_vm1 = vcmask 261120  }
  0xe7   : > { %1828 = vsyncadd (%p2374_p4), [#allocation16], 4294967280  ;;  %1315 = vmatprep.subr.bf16.mxu0 %v1859_v0  ;;  %1319 = vmatprep.mubr.msk.bf16.mxu0 %vm1860_vm0, %v1859_v0  ;;  %v415_v4 = vpack.c.bf16 %v414_v3, %v414_v3  ;;  %s1861_s12 = smov 96   ;;  %v1269_v21 = vld [vmem:[#allocation11] ss:$0 sm:$0xff]  ;;  %s1862_s14 = smov 32  }
  0xe8   : > { %1323 = vmatprep.subr.bf16.mxu1 %v1859_v0  ;;  %1325 = vmatprep.mubr.msk.bf16.mxu1 %vm1860_vm0, %v1859_v0  ;;  %v1267_v29 = vld [vmem:[#allocation8] ss:$0 sm:$0xff]  ;;  %v1268_v31 = vld [vmem:[#allocation9] ss:$0 sm:$0xff]  ;;  %v1270_v32 = vld [vmem:[#allocation12] ss:$0 sm:$0xff] }
  0xe9   : > { %1316 = vmatpush3.bf16.msra.mxu0 %v1515_v1  ;;  %s1863_s13 = smov 112   ;;  %s1864_s20 = smov 104   ;;  %vm553_vm2 = vcmask 64512   ;;  %vm618_vm3 = vcmask 1043456   ;;  %vm663_vm4 = vcmask 60416   ;;  %vm783_vm5 = vcmask 126016  }
  0xea   : > { %1317 = vmatprep.subr.bf16.mxu0 %v1859_v0  ;;  %s1865_s23 = smov 88   ;;  %s1866_s22 = smov 120   ;;  %vm902_vm6 = vcmask 191616   ;;  %vm1021_vm7 = vcmask 257216  }
  0xeb   : > { %s1867_s21 = smov 80   ;;  %s1868_s17 = smov 72  }
  0xec   : > { %s1869_s24 = smov 64   ;;  %s1870_s9 = smov 56  }
  0xed   : > { %1318 = vmatpush3.bf16.msra.mxu0 %v1516_v2  ;;  %s1871_s16 = smov 48   ;;  %p2375_p13 = scmp.ne.s32.totalorder %s2363_s26, 0 }
  0xee   : > { %1329 = vmatprep.subr.bf16.mxu0 %v1859_v0 }
  0xf0   : > { %1320 = vmatmul.mubr.msk.bf16.vlgmr.msra.gmra.mrb[0].mxu0 %vm432_vm1, %v415_v4 }
  0xf1   : > { %1331 = vmatprep.mubr.msk.bf16.mxu0 %vm1860_vm0, %v1859_v0 }
 0x1c3   : > { %v2231_v5 = vpop.f32.mrb[0].mxu0 }
 0x1c4   : > { %509 = vrot.lane.b32.xlu0 %v2231_v5, %s1861_s12  ;;  %v1321_v6 = vpop.f32.mrb[1].mxu0  ;;  %v478_v7 = vsel %vm432_vm1, %v2231_v5, 0.0 }
 0x1c5   : > { %479 = vadd.xlane.f32.xlu1 %v478_v7  ;;  %v473_v8 = vpop.f32.mrb[2].mxu0 }
 0x1c6   : > { %v1322_v9 = vpop.f32.mrb[3].mxu0 }
 0x236   : > { %v510_v10 = vpop.permute.xlu0 %509 }
 0x237   : > { %v512_v11 = vsel %vm432_vm1, %v510_v10, 0.0 }
 0x238   : > { %513 = vadd.xlane.f32.xlu0 %v512_v11 }
 0x252   : > { %v480_v12 = vpop.xlane.xlu1 %479 }
 0x253   : > { %v482_v13 = vmul.f32 0.03125, %v480_v12 }
 0x255   : > { %v483_v14 = vsub.f32 %v2231_v5, %v482_v13 }
 0x257   : > { %v484_v15 = vmul.f32 %v483_v14, %v483_v14 }
 0x259   : > { %v485_v16 = vsel %vm432_vm1, %v484_v15, 0.0 }
 0x25a   : > { %486 = vadd.xlane.f32.xlu0 %v485_v16 }
 0x270   : > { %534 = vrot.lane.b32.xlu0 %v1269_v21, %s1862_s14 }
 0x2c5   : > { %v514_v17 = vpop.xlane.xlu0 %513 }
 0x2c6   : > { %v515_v18 = vmul.f32 0.03125, %v514_v17 }
 0x2c8   : > { %v516_v19 = vsub.f32 %v2231_v5, %v515_v18 }
 0x2ca   : > { %v517_v20 = vmul.f32 %v516_v19, %v516_v19 }
 0x2cc   : > { %519 = vrot.lane.b32.xlu1 %v517_v20, %s1861_s12 }
 0x2e7   : > { %v487_v22 = vpop.xlane.xlu0 %486 }
 0x2e8   : > { %v488_v23 = vmul.f32 0.03125, %v487_v22 }
 0x2ea   : > { %v489_v24 = vadd.f32 1e-05, %v488_v23 }
 0x2eb   : > { %v535_v39 = vpop.permute.xlu0 %534 }
 0x2ec   : > { %1519 = vrsqrt.f32 %v489_v24 }
 0x2f6   : > { %v1520_v27 = vpop.eup %1519 }
 0x2f7   : > { %v491_v28 = vmul.f32 %v1520_v27, %v483_v14 }
 0x2f9   : > { %v498_v30 = vmul.f32 %v1267_v29, %v491_v28  ;;  %v549_v28 = vpack.c.bf16 %v2231_v5, %v2231_v5 }
 0x2fb   : > { %v505_v33 = vadd.f32 %v1268_v31, %v498_v30 }
 0x2fd   : > { %v547_v34 = vpack.c.bf16 %v505_v33, %v505_v33 }
 0x33e   : > { %v520_v25 = vpop.permute.xlu1 %519 }
 0x33f   : > { %v522_v26 = vsel %vm432_vm1, %v520_v25, 0.0 }
 0x340   : > { %523 = vadd.xlane.f32.xlu1 %v522_v26 }
 0x351   : > { %543 = vrot.lane.b32.xlu1 %v1270_v32, %s1862_s14  ;;  %s1873_s14 = smov 8  }
 0x355   : > { %785 = vrot.lane.b32.xlu1 %v547_v34, %s1863_s13  ;;  %s1874_s13 = smov 16  }
 0x359   : > { %904 = vrot.lane.b32.xlu1 %v547_v34, %s1864_s20  ;;  %s1875_s20 = smov 24  }
 0x3cd   : > { %v524_v35 = vpop.xlane.xlu1 %523 }
 0x3ce   : > { %v525_v36 = vmul.f32 0.03125, %v524_v35 }
 0x3d0   : > { %v526_v37 = vadd.f32 1e-05, %v525_v36 }
 0x3d1   : > { %v544_v42 = vpop.permute.xlu1 %543 }
 0x3d2   : > { %1521 = vrsqrt.f32 %v526_v37 }
 0x3d5   : > { %v786_v53 = vpop.permute.xlu1 %785 }
 0x3d9   : > { %v905_v55 = vpop.permute.xlu1 %904 }
 0x3dc   : > { %v1522_v38 = vpop.eup %1521 }
 0x3dd   : > { %v528_v40 = vmul.f32 %v1522_v38, %v516_v19 }
 0x3df   : > { %v537_v41 = vmul.f32 %v535_v39, %v528_v40 }
 0x3e1   : > { %v546_v43 = vadd.f32 %v544_v42, %v537_v41 }
 0x3e3   : > { %v548_v44 = vpack.c.bf16 %v546_v43, %v546_v43 }
 0x3e5   : > { %551 = vrot.lane.b32.xlu0 %v548_v44, %s1861_s12  ;;  %s1872_s12 = smov 40  }
 0x3e9   : > { %668 = vrot.lane.b32.xlu0 %v548_v44, %s1865_s23  ;;  %s1287_s23 = sshll.u32 %s1943_s11, 7  ;;  %s1092_s11 = scalar_lea.sflag [#allocation5], %s2194_s25 }
 0x3ed   : > { %666 = vrot.lane.b32.xlu0 %v547_v34, %s1866_s22  ;;  %s412_s22 = scalar_lea.vmem [#allocation17], %s1255_s19 }
 0x3f1   : > { %787 = vrot.lane.b32.xlu0 %v548_v44, %s1867_s21  ;;  %s1105_s21 = sshll.u32 %s412_s22, 4  ;;  %s2301_s21 = int_to_ptr.vmem [resolvable:$true] %s1105_s21 }
 0x3f2   : > { %s1765_s19 = scalar_lea.vmem %s2301_s21, 128 }
 0x3f3   : > { %p1766_p12 = scmp.ne.s32.totalorder %s2301_s21, %s1765_s19 }
 0x3f5   : > { %906 = vrot.lane.b32.xlu0 %v548_v44, %s1868_s17  ;;  %p1767_p1 = pnand %p1766_p12, %p2375_p13 }
 0x3f7   : > { %p1768_p3 = pneg %p1767_p1 }
 0x457   : > { %v552_v45 = vpop.permute.xlu0 %551 }
 0x458   : > { %v558_v46 = vsel %vm553_vm2, %v552_v45, 0 }
 0x459   : > { %1324 = vmatpush3.bf16.xpose.msra.mxu1 %v558_v46 }
 0x45a   : > { %1335 = vmatprep.subr.bf16.mxu1 %v1859_v0 }
 0x45b   : > { %v669_v47 = vpop.permute.xlu0 %668 }
 0x45c   : > { %v674_v49 = vsel %vm553_vm2, %v669_v47, 0 }
 0x45f   : > { %v667_v48 = vpop.permute.xlu0 %666 }
 0x460   : > { %1326 = vmatmul.mubr.msk.bf16.vlgmr.msra.gmra.mrb[0].mxu1 %vm553_vm2, %v547_v34 }
 0x461   : > { %1336 = vmatpush3.bf16.xpose.msra.mxu1 %v674_v49  ;;  %1337 = vmatprep.mubr.msk.bf16.mxu1 %vm1860_vm0, %v1859_v0 }
 0x462   : > { %1347 = vmatprep.subr.bf16.mxu1 %v1859_v0 }
 0x463   : > { %v788_v50 = vpop.permute.xlu0 %787 }
 0x464   : > { %v793_v51 = vsel %vm553_vm2, %v788_v50, 0 }
 0x467   : > { %v907_v52 = vpop.permute.xlu0 %906 }
 0x468   : > { %1338 = vmatmul.mubr.msk.bf16.vlgmr.msra.gmra.mrb[4].mxu1 %vm553_vm2, %v667_v48  ;;  %v912_v54 = vsel %vm553_vm2, %v907_v52, 0 }
 0x469   : > { %1348 = vmatpush3.bf16.xpose.msra.mxu1 %v793_v51  ;;  %1349 = vmatprep.mubr.msk.bf16.mxu1 %vm1860_vm0, %v1859_v0 }
 0x46a   : > { %1359 = vmatprep.subr.bf16.mxu1 %v1859_v0 }
 0x470   : > { %1350 = vmatmul.mubr.msk.bf16.vlgmr.msra.gmra.mrb[8].mxu1 %vm553_vm2, %v786_v53 }
 0x471   : > { %1360 = vmatpush3.bf16.xpose.msra.mxu1 %v912_v54  ;;  %1361 = vmatprep.mubr.msk.bf16.mxu1 %vm1860_vm0, %v1859_v0 }
 0x472   : > { %1371 = vmatprep.subr.bf16.mxu1 %v1859_v0 }
 0x478   : > { %1362 = vmatmul.mubr.msk.bf16.vlgmr.msra.gmra.mrb[12].mxu1 %vm553_vm2, %v905_v55 }
 0x479   : > { %1375 = vmatprep.mubr.msk.bf16.mxu1 %vm1860_vm0, %v1859_v0 }
 0x533   : > { %v594_v56 = vpop.f32.mrb[0].mxu1 }
 0x534   : > { %v1327_v57 = vpop.f32.mrb[1].mxu1  ;;  %v600_v58 = vsel %vm553_vm2, %v594_v56, -inf }
 0x535   : > { %601 = vmax.xlane.f32.xlu0 %v600_v58  ;;  %v597_v59 = vpop.f32.mrb[2].mxu1 }
 0x536   : > { %v1328_v60 = vpop.f32.mrb[3].mxu1 }
 0x53b   : > { %v710_v61 = vpop.f32.mrb[4].mxu1 }
 0x53c   : > { %v1339_v62 = vpop.f32.mrb[5].mxu1  ;;  %v716_v63 = vsel %vm553_vm2, %v710_v61, -inf }
 0x53d   : > { %717 = vmax.xlane.f32.xlu1 %v716_v63  ;;  %v713_v1 = vpop.f32.mrb[6].mxu1 }
 0x53e   : > { %v1340_v2 = vpop.f32.mrb[7].mxu1 }
 0x543   : > { %v829_v3 = vpop.f32.mrb[8].mxu1 }
 0x544   : > { %v1351_v4 = vpop.f32.mrb[9].mxu1  ;;  %v835_v6 = vsel %vm553_vm2, %v829_v3, -inf }
 0x545   : > { %836 = vmax.xlane.f32.xlu0 %v835_v6  ;;  %v832_v7 = vpop.f32.mrb[10].mxu1  ;;  %v1517_v6 = vld [vmem:[#allocation14] sm:$0xff]  }
 0x546   : > { %v1352_v8 = vpop.f32.mrb[11].mxu1  ;;  %1372 = vmatpush3.bf16.msra.mxu1 %v1517_v6 }
 0x547   : > { %v1518_v8 = vld [vmem:[#allocation14 + $0x8] sm:$0xff]   ;;  %1373 = vmatprep.subr.bf16.mxu1 %v1859_v0 }
 0x54a   : > { %1374 = vmatpush3.bf16.msra.mxu1 %v1518_v8 }
 0x54b   : > { %v948_v9 = vpop.f32.mrb[12].mxu1 }
 0x54c   : > { %v1363_v10 = vpop.f32.mrb[13].mxu1  ;;  %v954_v11 = vsel %vm553_vm2, %v948_v9, -inf }
 0x54d   : > { %955 = vmax.xlane.f32.xlu0 %v954_v11  ;;  %v951_v12 = vpop.f32.mrb[14].mxu1 }
 0x54e   : > { %v1364_v13 = vpop.f32.mrb[15].mxu1 }
 0x5c2   : > { %v602_v14 = vpop.xlane.xlu0 %601 }
 0x5c3   : > { %v603_v15 = vsub.f32 %v594_v56, %v602_v14 }
 0x5c5   : > { %v604_v16 = vmul.f32 1.442695, %v603_v15 }
 0x5c7   : > { %1523 = vpow2.f32 %v604_v16 }
 0x5ca   : > { %v718_v17 = vpop.xlane.xlu1 %717 }
 0x5cb   : > { %v719_v18 = vsub.f32 %v710_v61, %v718_v17 }
 0x5cd   : > { %v720_v19 = vmul.f32 1.442695, %v719_v18 }
 0x5cf   : > { %1525 = vpow2.f32 %v720_v19 }
 0x5d1   : > { %v1524_v20 = vpop.eup %1523 }
 0x5d2   : > { %v606_v21 = vsel %vm553_vm2, %v1524_v20, 0.0  ;;  %v837_v22 = vpop.xlane.xlu0 %836 }
 0x5d3   : > { %607 = vadd.xlane.f32.xlu1 %v606_v21  ;;  %v838_v31 = vsub.f32 %v829_v3, %v837_v22  ;;  %v1282_v21 = vld [vmem:[#allocation15] ss:$0 sm:$0xff] }
 0x5d5   : > { %v839_v32 = vmul.f32 1.442695, %v838_v31 }
 0x5d9   : > { %v1526_v23 = vpop.eup %1525 }
 0x5da   : > { %v956_v24 = vpop.xlane.xlu0 %955  ;;  %v722_v25 = vsel %vm553_vm2, %v1526_v23, 0.0 }
 0x5db   : > { %v957_v26 = vsub.f32 %v948_v9, %v956_v24  ;;  %723 = vadd.xlane.f32.xlu0 %v722_v25 }
 0x5dd   : > { %v958_v27 = vmul.f32 1.442695, %v957_v26 }
 0x5df   : > { %1527 = vpow2.f32 %v958_v27 }
 0x5e0   : > { %1529 = vpow2.f32 %v839_v32 }
 0x5e4   : > { %613 = vrot.lane.b32.xlu1 %v549_v28, %s1869_s24 }
 0x5e9   : > { %v1528_v29 = vpop.eup %1527 }
 0x5ea   : > { %v960_v30 = vsel %vm553_vm2, %v1528_v29, 0.0  ;;  %v1530_v33 = vpop.eup %1529 }
 0x5eb   : > { %961 = vadd.xlane.f32.xlu0 %v960_v30  ;;  %v841_v34 = vsel %vm553_vm2, %v1530_v33, 0.0 }
 0x601   : > { %728 = vrot.lane.b32.xlu0 %v549_v28, %s1870_s9  ;;  %s2299_s9 = scalar_lea.hbm %s2352_s8, %s1287_s23 }
 0x608   : > { %842 = vadd.xlane.f32.xlu1 %v841_v34 }
 0x619   : > { %847 = vrot.lane.b32.xlu1 %v549_v28, %s1871_s16  ;;  %s1876_s16 = smov [#allocation17]  }
 0x61d   : > { %966 = vrot.lane.b32.xlu1 %v549_v28, %s1872_s12  ;;  %s1769_s12 = sshll.u32 %s1876_s16, 4  ;;  %s1770_s12 = int_to_ptr.vmem [resolvable:$false] %s1769_s12 }
 0x61e   : > { %p1772_p2 = scmp.lt.s32.totalorder %s2301_s21, %s1770_s12 }
 0x660   : > { %v608_v5 = vpop.xlane.xlu1 %607 }
 0x661   : > { %1531 = vrcp.f32 %v608_v5 }
 0x664   : > { %v614_v35 = vpop.permute.xlu1 %613 }
 0x665   : > { %v620_v36 = vsel %vm618_vm3, %v614_v35, 0 }
 0x666   : > { %1330 = vmatpush3.bf16.msra.mxu0 %v620_v36 }
 0x667   : > { %1341 = vmatprep.subr.bf16.mxu0 %v1859_v0 }
 0x668   : > { %v724_v38 = vpop.xlane.xlu0 %723 }
 0x669   : > { %1533 = vrcp.f32 %v724_v38 }
 0x66b   : > { %v1532_v37 = vpop.eup %1531 }
 0x66c   : > { %v610_v39 = vmul.f32 %v1532_v37, %v1524_v20 }
 0x66e   : > { %v611_v40 = vpack.c.bf16 %v610_v39, %v610_v39 }
 0x670   : > { %1332 = vmatmul.mubr.msk.bf16.vlgmr.msra.gmra.mrb[4].mxu0 %vm553_vm2, %v611_v40 }
 0x671   : > { %1343 = vmatprep.mubr.msk.bf16.mxu0 %vm1860_vm0, %v1859_v0 }
 0x673   : > { %v1534_v41 = vpop.eup %1533 }
 0x674   : > { %v726_v43 = vmul.f32 %v1534_v41, %v1526_v23 }
 0x676   : > { %v727_v46 = vpack.c.bf16 %v726_v43, %v726_v43 }
 0x678   : > { %v962_v42 = vpop.xlane.xlu0 %961 }
 0x67c   : > { %v729_v44 = vpop.permute.xlu0 %728 }
 0x67d   : > { %v734_v45 = vsel %vm618_vm3, %v729_v44, 0 }
 0x67e   : > { %1342 = vmatpush3.bf16.msra.mxu0 %v734_v45 }
 0x67f   : > { %1353 = vmatprep.subr.bf16.mxu0 %v1859_v0 }
 0x681   : > { %1344 = vmatmul.mubr.msk.bf16.vlgmr.msra.gmra.mrb[8].mxu0 %vm553_vm2, %v727_v46 }
 0x682   : > { %1355 = vmatprep.mubr.msk.bf16.mxu0 %vm1860_vm0, %v1859_v0 }
 0x695   : > { %v843_v47 = vpop.xlane.xlu1 %842 }
 0x696   : > { %1535 = vrcp.f32 %v843_v47 }
 0x697   : > { %1537 = vrcp.f32 %v962_v42 }
 0x699   : > { %v848_v48 = vpop.permute.xlu1 %847 }
 0x69a   : > { %v853_v49 = vsel %vm618_vm3, %v848_v48, 0 }
 0x69b   : > { %1354 = vmatpush3.bf16.msra.mxu0 %v853_v49 }
 0x69c   : > { %1365 = vmatprep.subr.bf16.mxu0 %v1859_v0 }
 0x69d   : > { %v967_v52 = vpop.permute.xlu1 %966 }
 0x69e   : > { %v972_v55 = vsel %vm618_vm3, %v967_v52, 0 }
 0x6a0   : > { %v1536_v50 = vpop.eup %1535 }
 0x6a1   : > { %v845_v51 = vmul.f32 %v1536_v50, %v1530_v33  ;;  %v1538_v54 = vpop.eup %1537 }
 0x6a2   : > { %v964_v56 = vmul.f32 %v1538_v54, %v1528_v29 }
 0x6a3   : > { %v846_v53 = vpack.c.bf16 %v845_v51, %v845_v51 }
 0x6a4   : > { %v965_v57 = vpack.c.bf16 %v964_v56, %v964_v56 }
 0x6a5   : > { %1356 = vmatmul.mubr.msk.bf16.vlgmr.msra.gmra.mrb[12].mxu0 %vm553_vm2, %v846_v53 }
 0x6a6   : > { %1366 = vmatpush3.bf16.msra.mxu0 %v972_v55  ;;  %1367 = vmatprep.mubr.msk.bf16.mxu0 %vm1860_vm0, %v1859_v0 }
 0x6ad   : > { %1368 = vmatmul.mubr.msk.bf16.vlgmr.msra.gmra.mrb[16].mxu0 %vm553_vm2, %v965_v57 }
 0x743   : > { %v656_v58 = vpop.f32.mrb[4].mxu0 }
 0x744   : > { %v662_v59 = vpack.c.bf16 %v656_v58, %v656_v58  ;;  %v1333_v60 = vpop.f32.mrb[5].mxu0 }
 0x745   : > { %v659_v61 = vpop.f32.mrb[6].mxu0 }
 0x746   : > { %664 = vst.msk [vmem:[#allocation2] sm:$0xf] %vm663_vm4, %v662_v59  ;;  %v1334_v62 = vpop.f32.mrb[7].mxu0 }
 0x754   : > { %v770_v63 = vpop.f32.mrb[8].mxu0 }
 0x755   : > { %v1290_v1 = vpack.c.bf16 %v770_v63, %v770_v63  ;;  %v1345_v2 = vpop.f32.mrb[9].mxu0 }
 0x756   : > { %v773_v3 = vpop.f32.mrb[10].mxu0 }
 0x757   : > { %780 = vrot.lane.b32.xlu0 %v1290_v1, %s1873_s14  ;;  %v1346_v4 = vpop.f32.mrb[11].mxu0  ;;  %s1771_s14 = scalar_lea.vmem %s1770_s12, 256 }
 0x758   : > { %p1773_p0 = scmp.lt.s32.totalorder %s1771_s14, %s1765_s19 }
 0x75a   : > { %p1774_p6 = por %p1773_p0, %p1772_p2 }
 0x75c   : > { %p1775_p10 = pnand %p1774_p6, %p1768_p3 }
 0x778   : > { %v889_v7 = vpop.f32.mrb[12].mxu0 }
 0x779   : > { %v1291_v9 = vpack.c.bf16 %v889_v7, %v889_v7  ;;  %v1357_v10 = vpop.f32.mrb[13].mxu0 }
 0x77a   : > { %v892_v11 = vpop.f32.mrb[14].mxu0 }
 0x77b   : > { %899 = vrot.lane.b32.xlu1 %v1291_v9, %s1874_s13  ;;  %v1358_v12 = vpop.f32.mrb[15].mxu0 }
 0x780   : > { %v1008_v13 = vpop.f32.mrb[16].mxu0 }
 0x781   : > { %v1292_v14 = vpack.c.bf16 %v1008_v13, %v1008_v13  ;;  %v1369_v15 = vpop.f32.mrb[17].mxu0 }
 0x782   : > { %v1011_v16 = vpop.f32.mrb[18].mxu0 }
 0x783   : > { %1018 = vrot.lane.b32.xlu0 %v1292_v14, %s1875_s20  ;;  %v1370_v17 = vpop.f32.mrb[19].mxu0 }
 0x7c9   : > { %v781_v18 = vpop.permute.xlu0 %780 }
 0x7ca   : > { %784 = vst.msk [vmem:[#allocation2] sm:$0xf] %vm783_vm5, %v781_v18 }
 0x7ed   : > { %v900_v19 = vpop.permute.xlu1 %899 }
 0x7ee   : > { %903 = vst.msk [vmem:[#allocation2] sm:$0xf] %vm902_vm6, %v900_v19 }
 0x7f5   : > { %v1019_v0 = vpop.permute.xlu0 %1018 }
 0x7f6   : > { %1022 = vst.msk [vmem:[#allocation2] sm:$0xf] %vm1021_vm7, %v1019_v0 }
 0x7fd   : > { %v1023_v20 = vld [vmem:[#allocation2] sm:$0xf] }
 0x7fe   : > { %1376 = vmatmul.mubr.msk.bf16.vlgmr.msra.gmra.mrb[16].mxu1 %vm432_vm1, %v1023_v20 }
 0x8d1   : > { %v1084_v22 = vpop.f32.mrb[16].mxu1 }
 0x8d2   : > { %v1085_v23 = vadd.f32 %v1282_v21, %v1084_v22  ;;  %v1377_v24 = vpop.f32.mrb[17].mxu1 }
 0x8d3   : > { %v1087_v25 = vpop.f32.mrb[18].mxu1 }
 0x8d4   : > { %v1378_v26 = vpop.f32.mrb[19].mxu1  ;;  %1090 = vst.msk [vmem:[%s412_s22] sm:$0xff] %vm432_vm1, %v1085_v23 }
 0x8d5   : > { %1778 = shalt.err (!%p1775_p10)
}
 0x8d6   : > { %s1779_s25 = scalar_lea.hbm %s2299_s9, 128  ;;  %s1783_s23 = scalar_lea.hbm %s2352_s8, 256 }
 0x8d7   : > { %p1780_p11 = scmp.ne.s32.totalorder %s2299_s9, %s1779_s25  ;;  %p1784_p9 = scmp.lt.u32.totalorder %s2299_s9, %s2352_s8 }
 0x8d8   : > { %p1785_p7 = scmp.lt.u32.totalorder %s1783_s23, %s1779_s25  ;;  %p1787_p12 = scmp.lt.u32.totalorder %s1779_s25, %s2299_s9 }
 0x8d9   : > { %p1781_p8 = pnand %p1780_p11, %p2375_p13 }
 0x8da   : > { %p1786_p4 = por %p1785_p7, %p1784_p9 }
 0x8db   : > { %p1782_p5 = pneg %p1781_p8 }
 0x8dc   : > { %p1788_p1 = por %p1787_p12, %p1786_p4 }
 0x8de   : > { %p1789_p3 = pnand %p1788_p1, %p1782_p5 }
 0x8e0   : > { %1792 = shalt.err (!%p1789_p3)
}
 0x8e1   : > { %1409 = dma.vmem_to_hbm [thread:$0]  (%p2375_p13), %s2301_s21, 128, %s2299_s9, %s1092_s11  }
 0x8e2 PF: > { %s1117_s24 = sand.u32 1, %s1835_s27   ;;  %p2376_p2 = scmp.ne.s32.totalorder %s2364_s18, 0 }
 0x8e3   : > { %p2377_p0 = scmp.ge.s32.totalorder %s1847_s30, 2  ;;  %s1118_s19 = scalar_lea.sflag [#allocation5], %s1117_s24 }
 0x8e5   : > { %p1438_p6 = pnand %p2377_p0, %p2376_p2 }
 0x8e7   : > { %1830 = dma.done.wait (!%p1438_p6), %s1118_s19, 128  }
 0x8e8   : > { %1832 = vsyncadd (!%p1438_p6), %s1118_s19, 4294967168  ;;  %p25_p10 = scmp.ge.s32.totalorder %s2124_s15, 4   ;;  %s2378_s27 = smov %s1839_s28 }
 0x8e9   : > { %s2379_s28 = smov %s1843_s29  ;;  %s2380_s29 = smov %s2136_s10 }
 0x8ea   : > { %s2381_s30 = smov %s2124_s15  ;;  %27 = sbr.rel (!%p25_p10) target bundleno = 9 (0x9), region = 125 }
 0x8f1   :  { %1123 = vsyncpa [#allocation4], 1 }
 0x8f2   :  { %1125 = vsyncpa [#allocation4 + $0x1], 1 }
 0x8f3   :  { %1126 = vsyncpa [#allocation7], 1 }
 0x8f4   :  { %1127 = vsyncpa [#allocation10], 1 }
 0x8f5   :  { %1128 = vsyncpa [#allocation13], 1 }
 0x8f6   :  { %1129 = vsyncpa [#allocation16], 1 }
 0x8f7   :  { %1130 = vsyncpa [#allocation5], 1 }
 0x8f8   :  { %1132 = vsyncpa [#allocation5 + $0x1], 1 }

</bundles_post_ra>
